<compile_context>
chip_gen: v5e
topology: v5e:2x2
jax: 0.10.0
libtpu: 0.0.40
codegen_flags: <defaults>
</compile_context>

<pallas_src>
import math
import jax
import jax.numpy as jnp
from jax import lax
from jax.experimental import pallas as pl
from jax.experimental.pallas import tpu as pltpu

# ----------------------------- config (small, consistent shapes) ------------
SEQ = 8          # sequence length
BATCH = 2        # batch size
EMBED = 32       # d_model
HEADS = 4        # nhead
LAYERS = 2       # num_layers
EXPANSION = 4    # forward_expansion -> dim_feedforward = EMBED * EXPANSION
DFF = EMBED * EXPANSION
HEAD_DIM = EMBED // HEADS
SB = SEQ * BATCH                 # rows processed per matmul (batch folded in)
KW = max(3 * EMBED, DFF)         # packed "wide bias" row width
LN_EPS = 1e-5


def _layernorm(v, gamma, beta):
    # PyTorch LayerNorm: biased variance over the last dim (f32 math).
    mu = jnp.mean(v, axis=-1, keepdims=True)
    var = jnp.mean((v - mu) ** 2, axis=-1, keepdims=True)
    return (v - mu) * lax.rsqrt(var + LN_EPS) * gamma + beta


def fused_encoder_kernel(
    x_ref,        # (SB, E)      f32 activations, row order (s*B + b)
    ipw_ref,      # (L, E, 3E)   bf16  in_proj_weight^T (Q slice pre-scaled)
    opw_ref,      # (L, E, E)    bf16  out_proj.weight^T
    w1_ref,       # (L, E, DFF)  bf16  linear1.weight^T
    w2_ref,       # (L, DFF, E)  bf16  linear2.weight^T
    wideb_ref,    # (L, 2, KW)   f32   row0 = in_proj_bias (padded, Q pre-scaled)
                  #                    row1 = linear1.bias
    vecs_ref,     # (L, 6, E)    f32   [out_proj.bias, linear2.bias,
                  #                     norm1.w, norm1.b, norm2.w, norm2.b]
    o_ref,        # (SB, E)
):
    x2 = x_ref[...].astype(jnp.float32)                       # (SB, E) in VMEM

    # Static cross-batch mask: row i belongs to batch i % B (interleaved rows),
    # so attention logits between rows of different batch elements are killed.
    ri = lax.broadcasted_iota(jnp.int32, (HEADS * SB, SB), 0)
    ci = lax.broadcasted_iota(jnp.int32, (HEADS * SB, SB), 1)
    same_batch = (ri % BATCH) == (ci % BATCH)
    neg_big = jnp.float32(-1e30)

    for l in range(LAYERS):                                    # static layer loop
        ipw = ipw_ref[l]                                       # (E, 3E) bf16
        opw = opw_ref[l]                                       # (E, E)  bf16
        w1 = w1_ref[l]                                         # (E, DFF) bf16
        w2 = w2_ref[l]                                         # (DFF, E) bf16
        wb = wideb_ref[l]                                      # (2, KW) f32
        vc = vecs_ref[l]                                       # (6, E)  f32
        ipb = wb[0:1, :3 * EMBED]                              # (1, 3E)
        b1 = wb[1:2, :DFF]                                     # (1, DFF)
        opb, b2 = vc[0:1], vc[1:2]
        g1, be1, g2, be2 = vc[2:3], vc[3:4], vc[4:5], vc[5:6]

        # --- self-attention: QKV projection for the whole batch at once ----
        qkv = jnp.dot(x2.astype(jnp.bfloat16), ipw,
                      preferred_element_type=jnp.float32) + ipb  # (SB, 3E) f32
        q = qkv[:, 0 * EMBED:1 * EMBED]       # scale already folded into ipw/ipb
        k = qkv[:, 1 * EMBED:2 * EMBED]
        v = qkv[:, 2 * EMBED:3 * EMBED]

        # per-head scores, then ONE merged softmax over all heads
        s_list = []
        for h in range(HEADS):                                 # static head loop
            lo = h * HEAD_DIM
            qh = q[:, lo:lo + HEAD_DIM].astype(jnp.bfloat16)
            kh = k[:, lo:lo + HEAD_DIM].astype(jnp.bfloat16)
            s_list.append(lax.dot_general(qh, kh, (((1,), (1,)), ((), ())),
                                          preferred_element_type=jnp.float32))
        s_all = jnp.concatenate(s_list, axis=0)                # (H*SB, SB)
        s_all = jnp.where(same_batch, s_all, neg_big)          # kill cross-batch
        m = jnp.max(s_all, axis=-1, keepdims=True)
        p = jnp.exp(s_all - m)                                 # masked -> exactly 0
        inv_l = pl.reciprocal(jnp.sum(p, axis=-1, keepdims=True), approx=True)
        p = (p * inv_l).astype(jnp.bfloat16)

        # per-head context, concatenated back to (SB, E), ONE out-proj matmul
        ctx_list = []
        for h in range(HEADS):
            lo = h * HEAD_DIM
            vh = v[:, lo:lo + HEAD_DIM].astype(jnp.bfloat16)
            ctx_list.append(jnp.dot(p[h * SB:(h + 1) * SB, :], vh,
                                    preferred_element_type=jnp.float32))
        ctx = jnp.concatenate(ctx_list, axis=1)                # (SB, E) f32
        attn = jnp.dot(ctx.astype(jnp.bfloat16), opw,
                       preferred_element_type=jnp.float32) + opb

        # residual + norm1  (dropout is identity in eval mode)
        y1 = _layernorm(x2 + attn, g1, be1)

        # feed-forward: relu(y1 @ W1^T + b1) @ W2^T + b2 (weights pre-T'd)
        hdn = jnp.maximum(
            jnp.dot(y1.astype(jnp.bfloat16), w1,
                    preferred_element_type=jnp.float32) + b1, 0.0)   # (SB, DFF)
        ffn = jnp.dot(hdn.astype(jnp.bfloat16), w2,
                      preferred_element_type=jnp.float32) + b2       # (SB, E)

        # residual + norm2 -> next layer's input (stays in VMEM)
        x2 = _layernorm(y1 + ffn, g2, be2)

    o_ref[...] = x2.astype(o_ref.dtype)


# Static cost estimate (Python ints; lets XLA schedule around the custom call).
_FLOPS = LAYERS * (
    2 * SB * EMBED * 3 * EMBED          # QKV projection
    + 2 * 2 * HEADS * SB * SB * HEAD_DIM  # scores + context
    + 2 * SB * EMBED * EMBED            # out-projection
    + 2 * 2 * SB * EMBED * DFF          # FFN (two matmuls)
)
_TRANS = LAYERS * (HEADS * SB * SB + 2 * SB)   # exp + rsqrt


@jax.jit
def transformer_encoder(x_sbe, params):
    """x_sbe: (S, B, E) like PyTorch default batch_first=False."""
    S, B, E = x_sbe.shape
    rows = S * B
    # free, metadata-only leading-dim merge (no transpose, no HBM round trip)
    x2 = x_sbe.reshape(rows, E)

    weight_specs = [
        pl.BlockSpec(w.shape, (lambda i, _n=w.ndim: (0,) * _n)) for w in params
    ]
    bytes_accessed = int(
        2 * rows * E * x_sbe.dtype.itemsize
        + sum(int(w.size) * w.dtype.itemsize for w in params)
    )

    out = pl.pallas_call(
        fused_encoder_kernel,
        out_shape=jax.ShapeDtypeStruct((rows, E), x_sbe.dtype),
        grid_spec=pltpu.PrefetchScalarGridSpec(
            num_scalar_prefetch=0,
            grid=(1,),                                   # single fused step
            in_specs=[pl.BlockSpec((rows, E), lambda i: (0, 0))] + weight_specs,
            out_specs=pl.BlockSpec((rows, E), lambda i: (0, 0)),
        ),
        compiler_params=pltpu.CompilerParams(
            dimension_semantics=("arbitrary",)),
        cost_estimate=pl.CostEstimate(
            flops=_FLOPS, transcendentals=_TRANS, bytes_accessed=bytes_accessed),
    )(x2, *params)
    return out.reshape(S, B, E)


def init_params(key):
    """Per-layer PyTorch-style params, stacked on a leading LAYERS axis,
    pre-transposed (bf16) for direct x @ W matmuls, with the 1/sqrt(Dh)
    attention scale folded into the Q slice of in_proj weight + bias, and the
    small per-layer vectors packed into two arrays."""
    keys = jax.random.split(key, LAYERS * 6)
    scale = 1.0 / math.sqrt(HEAD_DIM)

    def u(k, shape, fan_in):
        bound = 1.0 / math.sqrt(fan_in)
        return jax.random.uniform(k, shape, jnp.float32, -bound, bound)

    ipw_t, opw_t, w1_t, w2_t, wideb, vecs = [], [], [], [], [], []
    for i in range(LAYERS):
        k = keys[i * 6:(i + 1) * 6]
        ipw = u(k[0], (3 * EMBED, EMBED), EMBED)          # in_proj_weight
        ipb = jnp.zeros((3 * EMBED,), jnp.float32)        # in_proj_bias (torch default 0)
        opw = u(k[1], (EMBED, EMBED), EMBED)              # out_proj.weight
        opb = jnp.zeros((EMBED,), jnp.float32)            # out_proj.bias (torch default 0)
        w1 = u(k[2], (DFF, EMBED), EMBED)                 # linear1.weight
        b1 = u(k[3], (DFF,), EMBED)                       # linear1.bias
        w2 = u(k[4], (EMBED, DFF), DFF)                   # linear2.weight
        b2 = u(k[5], (EMBED,), DFF)                       # linear2.bias
        g1 = jnp.ones((EMBED,), jnp.float32)
        be1 = jnp.zeros((EMBED,), jnp.float32)
        g2 = jnp.ones((EMBED,), jnp.float32)
        be2 = jnp.zeros((EMBED,), jnp.float32)

        # fold attention scale into Q slice (weight AND bias, f32, pre-cast)
        ipw = ipw.at[:EMBED].multiply(scale)
        ipb = ipb.at[:EMBED].multiply(scale)

        ipw_t.append(ipw.T.astype(jnp.bfloat16))          # (E, 3E)
        opw_t.append(opw.T.astype(jnp.bfloat16))          # (E, E)
        w1_t.append(w1.T.astype(jnp.bfloat16))            # (E, DFF)
        w2_t.append(w2.T.astype(jnp.bfloat16))            # (DFF, E)

        row0 = jnp.zeros((KW,), jnp.float32).at[:3 * EMBED].set(ipb)
        row1 = jnp.zeros((KW,), jnp.float32).at[:DFF].set(b1)
        wideb.append(jnp.stack([row0, row1], axis=0))     # (2, KW)
        vecs.append(jnp.stack([opb, b2, g1, be1, g2, be2], axis=0))  # (6, E)

    stk = lambda xs: jnp.stack(xs, axis=0)
    return (stk(ipw_t), stk(opw_t), stk(w1_t), stk(w2_t), stk(wideb), stk(vecs))


if __name__ == "__main__":
    root = jax.random.PRNGKey(0)
    kx, kp = jax.random.split(root)
    x = jax.random.normal(kx, (SEQ, BATCH, EMBED), jnp.float32)
    params = init_params(kp)

    out = transformer_encoder(x, params)
    jax.block_until_ready(out)
    assert out.shape == (SEQ, BATCH, EMBED)
    assert bool(jnp.all(jnp.isfinite(out)))
    print("KERNEL_OK")
</pallas_src>

<mosaic_0001>
module attributes {stable_mosaic.version = 11 : i64} {
  func.func @fused_encoder_kernel(%arg0: i32, %arg1: memref<16x32xf32, #tpu.memory_space<vmem>>, %arg2: memref<2x32x96xbf16, #tpu.memory_space<vmem>>, %arg3: memref<2x32x32xbf16, #tpu.memory_space<vmem>>, %arg4: memref<2x32x128xbf16, #tpu.memory_space<vmem>>, %arg5: memref<2x128x32xbf16, #tpu.memory_space<vmem>>, %arg6: memref<2x2x128xf32, #tpu.memory_space<vmem>>, %arg7: memref<2x6x32xf32, #tpu.memory_space<vmem>>, %arg8: memref<16x32xf32, #tpu.memory_space<vmem>>) attributes {dimension_semantics = [#tpu.dimension_semantics<arbitrary>], iteration_bounds = array<i64: 1>, scalar_prefetch = 0 : i64, scratch_operands = 0 : i64, tpu.core_type = #tpu.core_type<tc>, window_params = [{pipeline_mode = #tpu.pipeline_mode<synchronous>, transform_indices = @transform_0, window_bounds = array<i64: 16, 32>}, {pipeline_mode = #tpu.pipeline_mode<synchronous>, transform_indices = @transform_1, window_bounds = array<i64: 2, 32, 96>}, {pipeline_mode = #tpu.pipeline_mode<synchronous>, transform_indices = @transform_2, window_bounds = array<i64: 2, 32, 32>}, {pipeline_mode = #tpu.pipeline_mode<synchronous>, transform_indices = @transform_3, window_bounds = array<i64: 2, 32, 128>}, {pipeline_mode = #tpu.pipeline_mode<synchronous>, transform_indices = @transform_4, window_bounds = array<i64: 2, 128, 32>}, {pipeline_mode = #tpu.pipeline_mode<synchronous>, transform_indices = @transform_5, window_bounds = array<i64: 2, 2, 128>}, {pipeline_mode = #tpu.pipeline_mode<synchronous>, transform_indices = @transform_6, window_bounds = array<i64: 2, 6, 32>}, {pipeline_mode = #tpu.pipeline_mode<synchronous>, transform_indices = @transform_7, window_bounds = array<i64: 16, 32>}]} {
    %c0 = arith.constant 0 : index
    %c0_0 = arith.constant 0 : index
    %0 = vector.load %arg1[%c0, %c0_0] : memref<16x32xf32, #tpu.memory_space<vmem>>, vector<16x32xf32>
    %1 = tpu.iota {dimensions = array<i32: 0>} : vector<64x16xi32>
    %2 = tpu.iota {dimensions = array<i32: 1>} : vector<64x16xi32>
    %c2_i32 = arith.constant 2 : i32
    %c0_i32 = arith.constant 0 : i32
    %3 = arith.cmpi eq, %c2_i32, %c0_i32 : i32
    %c1_i32 = arith.constant 1 : i32
    %4 = arith.select %3, %c1_i32, %c2_i32 : i32
    %5 = vector.broadcast %4 : i32 to vector<64x16xi32>
    %6 = arith.remsi %1, %5 : vector<64x16xi32>
    %c0_i32_1 = arith.constant 0 : i32
    %7 = vector.broadcast %c0_i32_1 : i32 to vector<64x16xi32>
    %8 = arith.cmpi ne, %6, %7 : vector<64x16xi32>
    %c0_i32_2 = arith.constant 0 : i32
    %9 = vector.broadcast %c0_i32_2 : i32 to vector<64x16xi32>
    %10 = arith.cmpi slt, %6, %9 : vector<64x16xi32>
    %c0_i32_3 = arith.constant 0 : i32
    %11 = arith.cmpi slt, %4, %c0_i32_3 : i32
    %12 = vector.broadcast %11 : i1 to vector<64x16xi1>
    %13 = vector.broadcast %12 : vector<64x16xi1> to vector<64x16xi1>
    %14 = arith.xori %10, %13 : vector<64x16xi1>
    %15 = arith.andi %14, %8 : vector<64x16xi1>
    %16 = vector.broadcast %4 : i32 to vector<64x16xi32>
    %17 = arith.addi %6, %16 : vector<64x16xi32>
    %18 = arith.select %15, %17, %6 : vector<64x16xi1>, vector<64x16xi32>
    %c2_i32_4 = arith.constant 2 : i32
    %c0_i32_5 = arith.constant 0 : i32
    %19 = arith.cmpi eq, %c2_i32_4, %c0_i32_5 : i32
    %c1_i32_6 = arith.constant 1 : i32
    %20 = arith.select %19, %c1_i32_6, %c2_i32_4 : i32
    %21 = vector.broadcast %20 : i32 to vector<64x16xi32>
    %22 = arith.remsi %2, %21 : vector<64x16xi32>
    %c0_i32_7 = arith.constant 0 : i32
    %23 = vector.broadcast %c0_i32_7 : i32 to vector<64x16xi32>
    %24 = arith.cmpi ne, %22, %23 : vector<64x16xi32>
    %c0_i32_8 = arith.constant 0 : i32
    %25 = vector.broadcast %c0_i32_8 : i32 to vector<64x16xi32>
    %26 = arith.cmpi slt, %22, %25 : vector<64x16xi32>
    %c0_i32_9 = arith.constant 0 : i32
    %27 = arith.cmpi slt, %20, %c0_i32_9 : i32
    %28 = vector.broadcast %27 : i1 to vector<64x16xi1>
    %29 = vector.broadcast %28 : vector<64x16xi1> to vector<64x16xi1>
    %30 = arith.xori %26, %29 : vector<64x16xi1>
    %31 = arith.andi %30, %24 : vector<64x16xi1>
    %32 = vector.broadcast %20 : i32 to vector<64x16xi32>
    %33 = arith.addi %22, %32 : vector<64x16xi32>
    %34 = arith.select %31, %33, %22 : vector<64x16xi1>, vector<64x16xi32>
    %35 = arith.cmpi eq, %18, %34 : vector<64x16xi32>
    %c0_10 = arith.constant 0 : index
    %c0_11 = arith.constant 0 : index
    %c0_12 = arith.constant 0 : index
    %36 = vector.load %arg2[%c0_10, %c0_11, %c0_12] : memref<2x32x96xbf16, #tpu.memory_space<vmem>>, vector<1x32x96xbf16>
    %37 = vector.shape_cast %36 : vector<1x32x96xbf16> to vector<32x96xbf16>
    %c0_13 = arith.constant 0 : index
    %c0_14 = arith.constant 0 : index
    %c0_15 = arith.constant 0 : index
    %38 = vector.load %arg3[%c0_13, %c0_14, %c0_15] : memref<2x32x32xbf16, #tpu.memory_space<vmem>>, vector<1x32x32xbf16>
    %39 = vector.shape_cast %38 : vector<1x32x32xbf16> to vector<32x32xbf16>
    %c0_16 = arith.constant 0 : index
    %c0_17 = arith.constant 0 : index
    %c0_18 = arith.constant 0 : index
    %40 = vector.load %arg4[%c0_16, %c0_17, %c0_18] : memref<2x32x128xbf16, #tpu.memory_space<vmem>>, vector<1x32x128xbf16>
    %41 = vector.shape_cast %40 : vector<1x32x128xbf16> to vector<32x128xbf16>
    %c0_19 = arith.constant 0 : index
    %c0_20 = arith.constant 0 : index
    %c0_21 = arith.constant 0 : index
    %42 = vector.load %arg5[%c0_19, %c0_20, %c0_21] : memref<2x128x32xbf16, #tpu.memory_space<vmem>>, vector<1x128x32xbf16>
    %43 = vector.shape_cast %42 : vector<1x128x32xbf16> to vector<128x32xbf16>
    %c0_22 = arith.constant 0 : index
    %c0_23 = arith.constant 0 : index
    %c0_24 = arith.constant 0 : index
    %44 = vector.load %arg6[%c0_22, %c0_23, %c0_24] : memref<2x2x128xf32, #tpu.memory_space<vmem>>, vector<1x2x128xf32>
    %45 = vector.shape_cast %44 : vector<1x2x128xf32> to vector<2x128xf32>
    %c0_25 = arith.constant 0 : index
    %c0_26 = arith.constant 0 : index
    %c0_27 = arith.constant 0 : index
    %46 = vector.load %arg7[%c0_25, %c0_26, %c0_27] : memref<2x6x32xf32, #tpu.memory_space<vmem>>, vector<1x6x32xf32>
    %47 = vector.shape_cast %46 : vector<1x6x32xf32> to vector<6x32xf32>
    %48 = vector.extract_strided_slice %45 {offsets = [0, 0], sizes = [1, 96], strides = [1, 1]} : vector<2x128xf32> to vector<1x96xf32>
    %49 = vector.extract_strided_slice %45 {offsets = [1, 0], sizes = [1, 128], strides = [1, 1]} : vector<2x128xf32> to vector<1x128xf32>
    %50 = vector.extract_strided_slice %47 {offsets = [0, 0], sizes = [1, 32], strides = [1, 1]} : vector<6x32xf32> to vector<1x32xf32>
    %51 = vector.extract_strided_slice %47 {offsets = [1, 0], sizes = [1, 32], strides = [1, 1]} : vector<6x32xf32> to vector<1x32xf32>
    %52 = vector.extract_strided_slice %47 {offsets = [2, 0], sizes = [1, 32], strides = [1, 1]} : vector<6x32xf32> to vector<1x32xf32>
    %53 = vector.extract_strided_slice %47 {offsets = [3, 0], sizes = [1, 32], strides = [1, 1]} : vector<6x32xf32> to vector<1x32xf32>
    %54 = vector.extract_strided_slice %47 {offsets = [4, 0], sizes = [1, 32], strides = [1, 1]} : vector<6x32xf32> to vector<1x32xf32>
    %55 = vector.extract_strided_slice %47 {offsets = [5, 0], sizes = [1, 32], strides = [1, 1]} : vector<6x32xf32> to vector<1x32xf32>
    %56 = arith.truncf %0 : vector<16x32xf32> to vector<16x32xbf16>
    %cst = arith.constant dense<0.000000e+00> : vector<16x96xf32>
    %57 = tpu.matmul %56, %37, %cst {dimension_numbers = #tpu.dot_dimension_numbers<[1], [0], [0], [1], [0, 0, 1, 1], [], []>} : vector<16x32xbf16>, vector<32x96xbf16>, vector<16x96xf32> -> vector<16x96xf32>
    %58 = vector.broadcast %48 : vector<1x96xf32> to vector<16x96xf32>
    %59 = arith.addf %57, %58 : vector<16x96xf32>
    %60 = vector.extract_strided_slice %59 {offsets = [0, 0], sizes = [16, 32], strides = [1, 1]} : vector<16x96xf32> to vector<16x32xf32>
    %61 = vector.extract_strided_slice %59 {offsets = [0, 32], sizes = [16, 32], strides = [1, 1]} : vector<16x96xf32> to vector<16x32xf32>
    %62 = vector.extract_strided_slice %59 {offsets = [0, 64], sizes = [16, 32], strides = [1, 1]} : vector<16x96xf32> to vector<16x32xf32>
    %63 = vector.extract_strided_slice %60 {offsets = [0, 0], sizes = [16, 8], strides = [1, 1]} : vector<16x32xf32> to vector<16x8xf32>
    %64 = arith.truncf %63 : vector<16x8xf32> to vector<16x8xbf16>
    %65 = vector.extract_strided_slice %61 {offsets = [0, 0], sizes = [16, 8], strides = [1, 1]} : vector<16x32xf32> to vector<16x8xf32>
    %66 = arith.truncf %65 : vector<16x8xf32> to vector<16x8xbf16>
    %cst_28 = arith.constant dense<0.000000e+00> : vector<16x16xf32>
    %67 = tpu.matmul %64, %66, %cst_28 {dimension_numbers = #tpu.dot_dimension_numbers<[1], [1], [0], [0], [0, 0, 1, 0], [], []>} : vector<16x8xbf16>, vector<16x8xbf16>, vector<16x16xf32> -> vector<16x16xf32>
    %68 = vector.extract_strided_slice %60 {offsets = [0, 8], sizes = [16, 8], strides = [1, 1]} : vector<16x32xf32> to vector<16x8xf32>
    %69 = arith.truncf %68 : vector<16x8xf32> to vector<16x8xbf16>
    %70 = vector.extract_strided_slice %61 {offsets = [0, 8], sizes = [16, 8], strides = [1, 1]} : vector<16x32xf32> to vector<16x8xf32>
    %71 = arith.truncf %70 : vector<16x8xf32> to vector<16x8xbf16>
    %cst_29 = arith.constant dense<0.000000e+00> : vector<16x16xf32>
    %72 = tpu.matmul %69, %71, %cst_29 {dimension_numbers = #tpu.dot_dimension_numbers<[1], [1], [0], [0], [0, 0, 1, 0], [], []>} : vector<16x8xbf16>, vector<16x8xbf16>, vector<16x16xf32> -> vector<16x16xf32>
    %73 = vector.extract_strided_slice %60 {offsets = [0, 16], sizes = [16, 8], strides = [1, 1]} : vector<16x32xf32> to vector<16x8xf32>
    %74 = arith.truncf %73 : vector<16x8xf32> to vector<16x8xbf16>
    %75 = vector.extract_strided_slice %61 {offsets = [0, 16], sizes = [16, 8], strides = [1, 1]} : vector<16x32xf32> to vector<16x8xf32>
    %76 = arith.truncf %75 : vector<16x8xf32> to vector<16x8xbf16>
    %cst_30 = arith.constant dense<0.000000e+00> : vector<16x16xf32>
    %77 = tpu.matmul %74, %76, %cst_30 {dimension_numbers = #tpu.dot_dimension_numbers<[1], [1], [0], [0], [0, 0, 1, 0], [], []>} : vector<16x8xbf16>, vector<16x8xbf16>, vector<16x16xf32> -> vector<16x16xf32>
    %78 = vector.extract_strided_slice %60 {offsets = [0, 24], sizes = [16, 8], strides = [1, 1]} : vector<16x32xf32> to vector<16x8xf32>
    %79 = arith.truncf %78 : vector<16x8xf32> to vector<16x8xbf16>
    %80 = vector.extract_strided_slice %61 {offsets = [0, 24], sizes = [16, 8], strides = [1, 1]} : vector<16x32xf32> to vector<16x8xf32>
    %81 = arith.truncf %80 : vector<16x8xf32> to vector<16x8xbf16>
    %cst_31 = arith.constant dense<0.000000e+00> : vector<16x16xf32>
    %82 = tpu.matmul %79, %81, %cst_31 {dimension_numbers = #tpu.dot_dimension_numbers<[1], [1], [0], [0], [0, 0, 1, 0], [], []>} : vector<16x8xbf16>, vector<16x8xbf16>, vector<16x16xf32> -> vector<16x16xf32>
    %83 = tpu.concatenate %67, %72, %77, %82 in 0 : vector<16x16xf32>, vector<16x16xf32>, vector<16x16xf32>, vector<16x16xf32> -> vector<64x16xf32>
    %cst_32 = arith.constant -1.000000e+30 : f32
    %84 = vector.broadcast %cst_32 : f32 to vector<64x16xf32>
    %85 = arith.select %35, %83, %84 : vector<64x16xi1>, vector<64x16xf32>
    %cst_33 = arith.constant dense<0xFF800000> : vector<64xf32>
    %86 = vector.multi_reduction <maximumf>, %85, %cst_33 [1] : vector<64x16xf32> to vector<64xf32>
    %87 = vector.shape_cast %86 : vector<64xf32> to vector<64x1xf32>
    %88 = vector.broadcast %87 : vector<64x1xf32> to vector<64x16xf32>
    %89 = arith.subf %85, %88 : vector<64x16xf32>
    %90 = math.exp %89 : vector<64x16xf32>
    %cst_34 = arith.constant dense<0.000000e+00> : vector<64xf32>
    %91 = vector.multi_reduction <add>, %90, %cst_34 [1] : vector<64x16xf32> to vector<64xf32>
    %92 = vector.shape_cast %91 : vector<64xf32> to vector<64x1xf32>
    %93 = tpu.reciprocal %92 {approx = true} : vector<64x1xf32> -> vector<64x1xf32>
    %94 = vector.broadcast %93 : vector<64x1xf32> to vector<64x16xf32>
    %95 = arith.mulf %90, %94 : vector<64x16xf32>
    %96 = arith.truncf %95 : vector<64x16xf32> to vector<64x16xbf16>
    %97 = vector.extract_strided_slice %62 {offsets = [0, 0], sizes = [16, 8], strides = [1, 1]} : vector<16x32xf32> to vector<16x8xf32>
    %98 = arith.truncf %97 : vector<16x8xf32> to vector<16x8xbf16>
    %99 = vector.extract_strided_slice %96 {offsets = [0, 0], sizes = [16, 16], strides = [1, 1]} : vector<64x16xbf16> to vector<16x16xbf16>
    %cst_35 = arith.constant dense<0.000000e+00> : vector<16x8xf32>
    %100 = tpu.matmul %99, %98, %cst_35 {dimension_numbers = #tpu.dot_dimension_numbers<[1], [0], [0], [1], [0, 0, 1, 1], [], []>} : vector<16x16xbf16>, vector<16x8xbf16>, vector<16x8xf32> -> vector<16x8xf32>
    %101 = vector.extract_strided_slice %62 {offsets = [0, 8], sizes = [16, 8], strides = [1, 1]} : vector<16x32xf32> to vector<16x8xf32>
    %102 = arith.truncf %101 : vector<16x8xf32> to vector<16x8xbf16>
    %103 = vector.extract_strided_slice %96 {offsets = [16, 0], sizes = [16, 16], strides = [1, 1]} : vector<64x16xbf16> to vector<16x16xbf16>
    %cst_36 = arith.constant dense<0.000000e+00> : vector<16x8xf32>
    %104 = tpu.matmul %103, %102, %cst_36 {dimension_numbers = #tpu.dot_dimension_numbers<[1], [0], [0], [1], [0, 0, 1, 1], [], []>} : vector<16x16xbf16>, vector<16x8xbf16>, vector<16x8xf32> -> vector<16x8xf32>
    %105 = vector.extract_strided_slice %62 {offsets = [0, 16], sizes = [16, 8], strides = [1, 1]} : vector<16x32xf32> to vector<16x8xf32>
    %106 = arith.truncf %105 : vector<16x8xf32> to vector<16x8xbf16>
    %107 = vector.extract_strided_slice %96 {offsets = [32, 0], sizes = [16, 16], strides = [1, 1]} : vector<64x16xbf16> to vector<16x16xbf16>
    %cst_37 = arith.constant dense<0.000000e+00> : vector<16x8xf32>
    %108 = tpu.matmul %107, %106, %cst_37 {dimension_numbers = #tpu.dot_dimension_numbers<[1], [0], [0], [1], [0, 0, 1, 1], [], []>} : vector<16x16xbf16>, vector<16x8xbf16>, vector<16x8xf32> -> vector<16x8xf32>
    %109 = vector.extract_strided_slice %62 {offsets = [0, 24], sizes = [16, 8], strides = [1, 1]} : vector<16x32xf32> to vector<16x8xf32>
    %110 = arith.truncf %109 : vector<16x8xf32> to vector<16x8xbf16>
    %111 = vector.extract_strided_slice %96 {offsets = [48, 0], sizes = [16, 16], strides = [1, 1]} : vector<64x16xbf16> to vector<16x16xbf16>
    %cst_38 = arith.constant dense<0.000000e+00> : vector<16x8xf32>
    %112 = tpu.matmul %111, %110, %cst_38 {dimension_numbers = #tpu.dot_dimension_numbers<[1], [0], [0], [1], [0, 0, 1, 1], [], []>} : vector<16x16xbf16>, vector<16x8xbf16>, vector<16x8xf32> -> vector<16x8xf32>
    %113 = tpu.concatenate %100, %104, %108, %112 in 1 : vector<16x8xf32>, vector<16x8xf32>, vector<16x8xf32>, vector<16x8xf32> -> vector<16x32xf32>
    %114 = arith.truncf %113 : vector<16x32xf32> to vector<16x32xbf16>
    %cst_39 = arith.constant dense<0.000000e+00> : vector<16x32xf32>
    %115 = tpu.matmul %114, %39, %cst_39 {dimension_numbers = #tpu.dot_dimension_numbers<[1], [0], [0], [1], [0, 0, 1, 1], [], []>} : vector<16x32xbf16>, vector<32x32xbf16>, vector<16x32xf32> -> vector<16x32xf32>
    %116 = vector.broadcast %50 : vector<1x32xf32> to vector<16x32xf32>
    %117 = arith.addf %115, %116 : vector<16x32xf32>
    %118 = arith.addf %0, %117 : vector<16x32xf32>
    %cst_40 = arith.constant dense<0.000000e+00> : vector<16xf32>
    %119 = vector.multi_reduction <add>, %118, %cst_40 [1] : vector<16x32xf32> to vector<16xf32>
    %120 = vector.shape_cast %119 : vector<16xf32> to vector<16x1xf32>
    %cst_41 = arith.constant 3.200000e+01 : f32
    %121 = vector.broadcast %cst_41 : f32 to vector<16x1xf32>
    %122 = arith.divf %120, %121 : vector<16x1xf32>
    %123 = vector.broadcast %122 : vector<16x1xf32> to vector<16x32xf32>
    %124 = arith.subf %118, %123 : vector<16x32xf32>
    %125 = arith.mulf %124, %124 : vector<16x32xf32>
    %cst_42 = arith.constant dense<0.000000e+00> : vector<16xf32>
    %126 = vector.multi_reduction <add>, %125, %cst_42 [1] : vector<16x32xf32> to vector<16xf32>
    %127 = vector.shape_cast %126 : vector<16xf32> to vector<16x1xf32>
    %cst_43 = arith.constant 3.200000e+01 : f32
    %128 = vector.broadcast %cst_43 : f32 to vector<16x1xf32>
    %129 = arith.divf %127, %128 : vector<16x1xf32>
    %130 = vector.broadcast %122 : vector<16x1xf32> to vector<16x32xf32>
    %131 = arith.subf %118, %130 : vector<16x32xf32>
    %cst_44 = arith.constant 9.99999974E-6 : f32
    %132 = vector.broadcast %cst_44 : f32 to vector<16x1xf32>
    %133 = arith.addf %129, %132 : vector<16x1xf32>
    %134 = math.rsqrt %133 : vector<16x1xf32>
    %135 = vector.broadcast %134 : vector<16x1xf32> to vector<16x32xf32>
    %136 = arith.mulf %131, %135 : vector<16x32xf32>
    %137 = vector.broadcast %52 : vector<1x32xf32> to vector<16x32xf32>
    %138 = arith.mulf %136, %137 : vector<16x32xf32>
    %139 = vector.broadcast %53 : vector<1x32xf32> to vector<16x32xf32>
    %140 = arith.addf %138, %139 : vector<16x32xf32>
    %141 = arith.truncf %140 : vector<16x32xf32> to vector<16x32xbf16>
    %cst_45 = arith.constant dense<0.000000e+00> : vector<16x128xf32>
    %142 = tpu.matmul %141, %41, %cst_45 {dimension_numbers = #tpu.dot_dimension_numbers<[1], [0], [0], [1], [0, 0, 1, 1], [], []>} : vector<16x32xbf16>, vector<32x128xbf16>, vector<16x128xf32> -> vector<16x128xf32>
    %143 = vector.broadcast %49 : vector<1x128xf32> to vector<16x128xf32>
    %144 = arith.addf %142, %143 : vector<16x128xf32>
    %cst_46 = arith.constant 0.000000e+00 : f32
    %145 = vector.broadcast %cst_46 : f32 to vector<16x128xf32>
    %146 = arith.maximumf %144, %145 : vector<16x128xf32>
    %147 = arith.truncf %146 : vector<16x128xf32> to vector<16x128xbf16>
    %cst_47 = arith.constant dense<0.000000e+00> : vector<16x32xf32>
    %148 = tpu.matmul %147, %43, %cst_47 {dimension_numbers = #tpu.dot_dimension_numbers<[1], [0], [0], [1], [0, 0, 1, 1], [], []>} : vector<16x128xbf16>, vector<128x32xbf16>, vector<16x32xf32> -> vector<16x32xf32>
    %149 = vector.broadcast %51 : vector<1x32xf32> to vector<16x32xf32>
    %150 = arith.addf %148, %149 : vector<16x32xf32>
    %151 = arith.addf %140, %150 : vector<16x32xf32>
    %cst_48 = arith.constant dense<0.000000e+00> : vector<16xf32>
    %152 = vector.multi_reduction <add>, %151, %cst_48 [1] : vector<16x32xf32> to vector<16xf32>
    %153 = vector.shape_cast %152 : vector<16xf32> to vector<16x1xf32>
    %cst_49 = arith.constant 3.200000e+01 : f32
    %154 = vector.broadcast %cst_49 : f32 to vector<16x1xf32>
    %155 = arith.divf %153, %154 : vector<16x1xf32>
    %156 = vector.broadcast %155 : vector<16x1xf32> to vector<16x32xf32>
    %157 = arith.subf %151, %156 : vector<16x32xf32>
    %158 = arith.mulf %157, %157 : vector<16x32xf32>
    %cst_50 = arith.constant dense<0.000000e+00> : vector<16xf32>
    %159 = vector.multi_reduction <add>, %158, %cst_50 [1] : vector<16x32xf32> to vector<16xf32>
    %160 = vector.shape_cast %159 : vector<16xf32> to vector<16x1xf32>
    %cst_51 = arith.constant 3.200000e+01 : f32
    %161 = vector.broadcast %cst_51 : f32 to vector<16x1xf32>
    %162 = arith.divf %160, %161 : vector<16x1xf32>
    %163 = vector.broadcast %155 : vector<16x1xf32> to vector<16x32xf32>
    %164 = arith.subf %151, %163 : vector<16x32xf32>
    %cst_52 = arith.constant 9.99999974E-6 : f32
    %165 = vector.broadcast %cst_52 : f32 to vector<16x1xf32>
    %166 = arith.addf %162, %165 : vector<16x1xf32>
    %167 = math.rsqrt %166 : vector<16x1xf32>
    %168 = vector.broadcast %167 : vector<16x1xf32> to vector<16x32xf32>
    %169 = arith.mulf %164, %168 : vector<16x32xf32>
    %170 = vector.broadcast %54 : vector<1x32xf32> to vector<16x32xf32>
    %171 = arith.mulf %169, %170 : vector<16x32xf32>
    %172 = vector.broadcast %55 : vector<1x32xf32> to vector<16x32xf32>
    %173 = arith.addf %171, %172 : vector<16x32xf32>
    %c1 = arith.constant 1 : index
    %c0_53 = arith.constant 0 : index
    %c0_54 = arith.constant 0 : index
    %174 = vector.load %arg2[%c1, %c0_53, %c0_54] : memref<2x32x96xbf16, #tpu.memory_space<vmem>>, vector<1x32x96xbf16>
    %175 = vector.shape_cast %174 : vector<1x32x96xbf16> to vector<32x96xbf16>
    %c1_55 = arith.constant 1 : index
    %c0_56 = arith.constant 0 : index
    %c0_57 = arith.constant 0 : index
    %176 = vector.load %arg3[%c1_55, %c0_56, %c0_57] : memref<2x32x32xbf16, #tpu.memory_space<vmem>>, vector<1x32x32xbf16>
    %177 = vector.shape_cast %176 : vector<1x32x32xbf16> to vector<32x32xbf16>
    %c1_58 = arith.constant 1 : index
    %c0_59 = arith.constant 0 : index
    %c0_60 = arith.constant 0 : index
    %178 = vector.load %arg4[%c1_58, %c0_59, %c0_60] : memref<2x32x128xbf16, #tpu.memory_space<vmem>>, vector<1x32x128xbf16>
    %179 = vector.shape_cast %178 : vector<1x32x128xbf16> to vector<32x128xbf16>
    %c1_61 = arith.constant 1 : index
    %c0_62 = arith.constant 0 : index
    %c0_63 = arith.constant 0 : index
    %180 = vector.load %arg5[%c1_61, %c0_62, %c0_63] : memref<2x128x32xbf16, #tpu.memory_space<vmem>>, vector<1x128x32xbf16>
    %181 = vector.shape_cast %180 : vector<1x128x32xbf16> to vector<128x32xbf16>
    %c1_64 = arith.constant 1 : index
    %c0_65 = arith.constant 0 : index
    %c0_66 = arith.constant 0 : index
    %182 = vector.load %arg6[%c1_64, %c0_65, %c0_66] : memref<2x2x128xf32, #tpu.memory_space<vmem>>, vector<1x2x128xf32>
    %183 = vector.shape_cast %182 : vector<1x2x128xf32> to vector<2x128xf32>
    %c1_67 = arith.constant 1 : index
    %c0_68 = arith.constant 0 : index
    %c0_69 = arith.constant 0 : index
    %184 = vector.load %arg7[%c1_67, %c0_68, %c0_69] : memref<2x6x32xf32, #tpu.memory_space<vmem>>, vector<1x6x32xf32>
    %185 = vector.shape_cast %184 : vector<1x6x32xf32> to vector<6x32xf32>
    %186 = vector.extract_strided_slice %183 {offsets = [0, 0], sizes = [1, 96], strides = [1, 1]} : vector<2x128xf32> to vector<1x96xf32>
    %187 = vector.extract_strided_slice %183 {offsets = [1, 0], sizes = [1, 128], strides = [1, 1]} : vector<2x128xf32> to vector<1x128xf32>
    %188 = vector.extract_strided_slice %185 {offsets = [0, 0], sizes = [1, 32], strides = [1, 1]} : vector<6x32xf32> to vector<1x32xf32>
    %189 = vector.extract_strided_slice %185 {offsets = [1, 0], sizes = [1, 32], strides = [1, 1]} : vector<6x32xf32> to vector<1x32xf32>
    %190 = vector.extract_strided_slice %185 {offsets = [2, 0], sizes = [1, 32], strides = [1, 1]} : vector<6x32xf32> to vector<1x32xf32>
    %191 = vector.extract_strided_slice %185 {offsets = [3, 0], sizes = [1, 32], strides = [1, 1]} : vector<6x32xf32> to vector<1x32xf32>
    %192 = vector.extract_strided_slice %185 {offsets = [4, 0], sizes = [1, 32], strides = [1, 1]} : vector<6x32xf32> to vector<1x32xf32>
    %193 = vector.extract_strided_slice %185 {offsets = [5, 0], sizes = [1, 32], strides = [1, 1]} : vector<6x32xf32> to vector<1x32xf32>
    %194 = arith.truncf %173 : vector<16x32xf32> to vector<16x32xbf16>
    %cst_70 = arith.constant dense<0.000000e+00> : vector<16x96xf32>
    %195 = tpu.matmul %194, %175, %cst_70 {dimension_numbers = #tpu.dot_dimension_numbers<[1], [0], [0], [1], [0, 0, 1, 1], [], []>} : vector<16x32xbf16>, vector<32x96xbf16>, vector<16x96xf32> -> vector<16x96xf32>
    %196 = vector.broadcast %186 : vector<1x96xf32> to vector<16x96xf32>
    %197 = arith.addf %195, %196 : vector<16x96xf32>
    %198 = vector.extract_strided_slice %197 {offsets = [0, 0], sizes = [16, 32], strides = [1, 1]} : vector<16x96xf32> to vector<16x32xf32>
    %199 = vector.extract_strided_slice %197 {offsets = [0, 32], sizes = [16, 32], strides = [1, 1]} : vector<16x96xf32> to vector<16x32xf32>
    %200 = vector.extract_strided_slice %197 {offsets = [0, 64], sizes = [16, 32], strides = [1, 1]} : vector<16x96xf32> to vector<16x32xf32>
    %201 = vector.extract_strided_slice %198 {offsets = [0, 0], sizes = [16, 8], strides = [1, 1]} : vector<16x32xf32> to vector<16x8xf32>
    %202 = arith.truncf %201 : vector<16x8xf32> to vector<16x8xbf16>
    %203 = vector.extract_strided_slice %199 {offsets = [0, 0], sizes = [16, 8], strides = [1, 1]} : vector<16x32xf32> to vector<16x8xf32>
    %204 = arith.truncf %203 : vector<16x8xf32> to vector<16x8xbf16>
    %cst_71 = arith.constant dense<0.000000e+00> : vector<16x16xf32>
    %205 = tpu.matmul %202, %204, %cst_71 {dimension_numbers = #tpu.dot_dimension_numbers<[1], [1], [0], [0], [0, 0, 1, 0], [], []>} : vector<16x8xbf16>, vector<16x8xbf16>, vector<16x16xf32> -> vector<16x16xf32>
    %206 = vector.extract_strided_slice %198 {offsets = [0, 8], sizes = [16, 8], strides = [1, 1]} : vector<16x32xf32> to vector<16x8xf32>
    %207 = arith.truncf %206 : vector<16x8xf32> to vector<16x8xbf16>
    %208 = vector.extract_strided_slice %199 {offsets = [0, 8], sizes = [16, 8], strides = [1, 1]} : vector<16x32xf32> to vector<16x8xf32>
    %209 = arith.truncf %208 : vector<16x8xf32> to vector<16x8xbf16>
    %cst_72 = arith.constant dense<0.000000e+00> : vector<16x16xf32>
    %210 = tpu.matmul %207, %209, %cst_72 {dimension_numbers = #tpu.dot_dimension_numbers<[1], [1], [0], [0], [0, 0, 1, 0], [], []>} : vector<16x8xbf16>, vector<16x8xbf16>, vector<16x16xf32> -> vector<16x16xf32>
    %211 = vector.extract_strided_slice %198 {offsets = [0, 16], sizes = [16, 8], strides = [1, 1]} : vector<16x32xf32> to vector<16x8xf32>
    %212 = arith.truncf %211 : vector<16x8xf32> to vector<16x8xbf16>
    %213 = vector.extract_strided_slice %199 {offsets = [0, 16], sizes = [16, 8], strides = [1, 1]} : vector<16x32xf32> to vector<16x8xf32>
    %214 = arith.truncf %213 : vector<16x8xf32> to vector<16x8xbf16>
    %cst_73 = arith.constant dense<0.000000e+00> : vector<16x16xf32>
    %215 = tpu.matmul %212, %214, %cst_73 {dimension_numbers = #tpu.dot_dimension_numbers<[1], [1], [0], [0], [0, 0, 1, 0], [], []>} : vector<16x8xbf16>, vector<16x8xbf16>, vector<16x16xf32> -> vector<16x16xf32>
    %216 = vector.extract_strided_slice %198 {offsets = [0, 24], sizes = [16, 8], strides = [1, 1]} : vector<16x32xf32> to vector<16x8xf32>
    %217 = arith.truncf %216 : vector<16x8xf32> to vector<16x8xbf16>
    %218 = vector.extract_strided_slice %199 {offsets = [0, 24], sizes = [16, 8], strides = [1, 1]} : vector<16x32xf32> to vector<16x8xf32>
    %219 = arith.truncf %218 : vector<16x8xf32> to vector<16x8xbf16>
    %cst_74 = arith.constant dense<0.000000e+00> : vector<16x16xf32>
    %220 = tpu.matmul %217, %219, %cst_74 {dimension_numbers = #tpu.dot_dimension_numbers<[1], [1], [0], [0], [0, 0, 1, 0], [], []>} : vector<16x8xbf16>, vector<16x8xbf16>, vector<16x16xf32> -> vector<16x16xf32>
    %221 = tpu.concatenate %205, %210, %215, %220 in 0 : vector<16x16xf32>, vector<16x16xf32>, vector<16x16xf32>, vector<16x16xf32> -> vector<64x16xf32>
    %cst_75 = arith.constant -1.000000e+30 : f32
    %222 = vector.broadcast %cst_75 : f32 to vector<64x16xf32>
    %223 = arith.select %35, %221, %222 : vector<64x16xi1>, vector<64x16xf32>
    %cst_76 = arith.constant dense<0xFF800000> : vector<64xf32>
    %224 = vector.multi_reduction <maximumf>, %223, %cst_76 [1] : vector<64x16xf32> to vector<64xf32>
    %225 = vector.shape_cast %224 : vector<64xf32> to vector<64x1xf32>
    %226 = vector.broadcast %225 : vector<64x1xf32> to vector<64x16xf32>
    %227 = arith.subf %223, %226 : vector<64x16xf32>
    %228 = math.exp %227 : vector<64x16xf32>
    %cst_77 = arith.constant dense<0.000000e+00> : vector<64xf32>
    %229 = vector.multi_reduction <add>, %228, %cst_77 [1] : vector<64x16xf32> to vector<64xf32>
    %230 = vector.shape_cast %229 : vector<64xf32> to vector<64x1xf32>
    %231 = tpu.reciprocal %230 {approx = true} : vector<64x1xf32> -> vector<64x1xf32>
    %232 = vector.broadcast %231 : vector<64x1xf32> to vector<64x16xf32>
    %233 = arith.mulf %228, %232 : vector<64x16xf32>
    %234 = arith.truncf %233 : vector<64x16xf32> to vector<64x16xbf16>
    %235 = vector.extract_strided_slice %200 {offsets = [0, 0], sizes = [16, 8], strides = [1, 1]} : vector<16x32xf32> to vector<16x8xf32>
    %236 = arith.truncf %235 : vector<16x8xf32> to vector<16x8xbf16>
    %237 = vector.extract_strided_slice %234 {offsets = [0, 0], sizes = [16, 16], strides = [1, 1]} : vector<64x16xbf16> to vector<16x16xbf16>
    %cst_78 = arith.constant dense<0.000000e+00> : vector<16x8xf32>
    %238 = tpu.matmul %237, %236, %cst_78 {dimension_numbers = #tpu.dot_dimension_numbers<[1], [0], [0], [1], [0, 0, 1, 1], [], []>} : vector<16x16xbf16>, vector<16x8xbf16>, vector<16x8xf32> -> vector<16x8xf32>
    %239 = vector.extract_strided_slice %200 {offsets = [0, 8], sizes = [16, 8], strides = [1, 1]} : vector<16x32xf32> to vector<16x8xf32>
    %240 = arith.truncf %239 : vector<16x8xf32> to vector<16x8xbf16>
    %241 = vector.extract_strided_slice %234 {offsets = [16, 0], sizes = [16, 16], strides = [1, 1]} : vector<64x16xbf16> to vector<16x16xbf16>
    %cst_79 = arith.constant dense<0.000000e+00> : vector<16x8xf32>
    %242 = tpu.matmul %241, %240, %cst_79 {dimension_numbers = #tpu.dot_dimension_numbers<[1], [0], [0], [1], [0, 0, 1, 1], [], []>} : vector<16x16xbf16>, vector<16x8xbf16>, vector<16x8xf32> -> vector<16x8xf32>
    %243 = vector.extract_strided_slice %200 {offsets = [0, 16], sizes = [16, 8], strides = [1, 1]} : vector<16x32xf32> to vector<16x8xf32>
    %244 = arith.truncf %243 : vector<16x8xf32> to vector<16x8xbf16>
    %245 = vector.extract_strided_slice %234 {offsets = [32, 0], sizes = [16, 16], strides = [1, 1]} : vector<64x16xbf16> to vector<16x16xbf16>
    %cst_80 = arith.constant dense<0.000000e+00> : vector<16x8xf32>
    %246 = tpu.matmul %245, %244, %cst_80 {dimension_numbers = #tpu.dot_dimension_numbers<[1], [0], [0], [1], [0, 0, 1, 1], [], []>} : vector<16x16xbf16>, vector<16x8xbf16>, vector<16x8xf32> -> vector<16x8xf32>
    %247 = vector.extract_strided_slice %200 {offsets = [0, 24], sizes = [16, 8], strides = [1, 1]} : vector<16x32xf32> to vector<16x8xf32>
    %248 = arith.truncf %247 : vector<16x8xf32> to vector<16x8xbf16>
    %249 = vector.extract_strided_slice %234 {offsets = [48, 0], sizes = [16, 16], strides = [1, 1]} : vector<64x16xbf16> to vector<16x16xbf16>
    %cst_81 = arith.constant dense<0.000000e+00> : vector<16x8xf32>
    %250 = tpu.matmul %249, %248, %cst_81 {dimension_numbers = #tpu.dot_dimension_numbers<[1], [0], [0], [1], [0, 0, 1, 1], [], []>} : vector<16x16xbf16>, vector<16x8xbf16>, vector<16x8xf32> -> vector<16x8xf32>
    %251 = tpu.concatenate %238, %242, %246, %250 in 1 : vector<16x8xf32>, vector<16x8xf32>, vector<16x8xf32>, vector<16x8xf32> -> vector<16x32xf32>
    %252 = arith.truncf %251 : vector<16x32xf32> to vector<16x32xbf16>
    %cst_82 = arith.constant dense<0.000000e+00> : vector<16x32xf32>
    %253 = tpu.matmul %252, %177, %cst_82 {dimension_numbers = #tpu.dot_dimension_numbers<[1], [0], [0], [1], [0, 0, 1, 1], [], []>} : vector<16x32xbf16>, vector<32x32xbf16>, vector<16x32xf32> -> vector<16x32xf32>
    %254 = vector.broadcast %188 : vector<1x32xf32> to vector<16x32xf32>
    %255 = arith.addf %253, %254 : vector<16x32xf32>
    %256 = arith.addf %173, %255 : vector<16x32xf32>
    %cst_83 = arith.constant dense<0.000000e+00> : vector<16xf32>
    %257 = vector.multi_reduction <add>, %256, %cst_83 [1] : vector<16x32xf32> to vector<16xf32>
    %258 = vector.shape_cast %257 : vector<16xf32> to vector<16x1xf32>
    %cst_84 = arith.constant 3.200000e+01 : f32
    %259 = vector.broadcast %cst_84 : f32 to vector<16x1xf32>
    %260 = arith.divf %258, %259 : vector<16x1xf32>
    %261 = vector.broadcast %260 : vector<16x1xf32> to vector<16x32xf32>
    %262 = arith.subf %256, %261 : vector<16x32xf32>
    %263 = arith.mulf %262, %262 : vector<16x32xf32>
    %cst_85 = arith.constant dense<0.000000e+00> : vector<16xf32>
    %264 = vector.multi_reduction <add>, %263, %cst_85 [1] : vector<16x32xf32> to vector<16xf32>
    %265 = vector.shape_cast %264 : vector<16xf32> to vector<16x1xf32>
    %cst_86 = arith.constant 3.200000e+01 : f32
    %266 = vector.broadcast %cst_86 : f32 to vector<16x1xf32>
    %267 = arith.divf %265, %266 : vector<16x1xf32>
    %268 = vector.broadcast %260 : vector<16x1xf32> to vector<16x32xf32>
    %269 = arith.subf %256, %268 : vector<16x32xf32>
    %cst_87 = arith.constant 9.99999974E-6 : f32
    %270 = vector.broadcast %cst_87 : f32 to vector<16x1xf32>
    %271 = arith.addf %267, %270 : vector<16x1xf32>
    %272 = math.rsqrt %271 : vector<16x1xf32>
    %273 = vector.broadcast %272 : vector<16x1xf32> to vector<16x32xf32>
    %274 = arith.mulf %269, %273 : vector<16x32xf32>
    %275 = vector.broadcast %190 : vector<1x32xf32> to vector<16x32xf32>
    %276 = arith.mulf %274, %275 : vector<16x32xf32>
    %277 = vector.broadcast %191 : vector<1x32xf32> to vector<16x32xf32>
    %278 = arith.addf %276, %277 : vector<16x32xf32>
    %279 = arith.truncf %278 : vector<16x32xf32> to vector<16x32xbf16>
    %cst_88 = arith.constant dense<0.000000e+00> : vector<16x128xf32>
    %280 = tpu.matmul %279, %179, %cst_88 {dimension_numbers = #tpu.dot_dimension_numbers<[1], [0], [0], [1], [0, 0, 1, 1], [], []>} : vector<16x32xbf16>, vector<32x128xbf16>, vector<16x128xf32> -> vector<16x128xf32>
    %281 = vector.broadcast %187 : vector<1x128xf32> to vector<16x128xf32>
    %282 = arith.addf %280, %281 : vector<16x128xf32>
    %cst_89 = arith.constant 0.000000e+00 : f32
    %283 = vector.broadcast %cst_89 : f32 to vector<16x128xf32>
    %284 = arith.maximumf %282, %283 : vector<16x128xf32>
    %285 = arith.truncf %284 : vector<16x128xf32> to vector<16x128xbf16>
    %cst_90 = arith.constant dense<0.000000e+00> : vector<16x32xf32>
    %286 = tpu.matmul %285, %181, %cst_90 {dimension_numbers = #tpu.dot_dimension_numbers<[1], [0], [0], [1], [0, 0, 1, 1], [], []>} : vector<16x128xbf16>, vector<128x32xbf16>, vector<16x32xf32> -> vector<16x32xf32>
    %287 = vector.broadcast %189 : vector<1x32xf32> to vector<16x32xf32>
    %288 = arith.addf %286, %287 : vector<16x32xf32>
    %289 = arith.addf %278, %288 : vector<16x32xf32>
    %cst_91 = arith.constant dense<0.000000e+00> : vector<16xf32>
    %290 = vector.multi_reduction <add>, %289, %cst_91 [1] : vector<16x32xf32> to vector<16xf32>
    %291 = vector.shape_cast %290 : vector<16xf32> to vector<16x1xf32>
    %cst_92 = arith.constant 3.200000e+01 : f32
    %292 = vector.broadcast %cst_92 : f32 to vector<16x1xf32>
    %293 = arith.divf %291, %292 : vector<16x1xf32>
    %294 = vector.broadcast %293 : vector<16x1xf32> to vector<16x32xf32>
    %295 = arith.subf %289, %294 : vector<16x32xf32>
    %296 = arith.mulf %295, %295 : vector<16x32xf32>
    %cst_93 = arith.constant dense<0.000000e+00> : vector<16xf32>
    %297 = vector.multi_reduction <add>, %296, %cst_93 [1] : vector<16x32xf32> to vector<16xf32>
    %298 = vector.shape_cast %297 : vector<16xf32> to vector<16x1xf32>
    %cst_94 = arith.constant 3.200000e+01 : f32
    %299 = vector.broadcast %cst_94 : f32 to vector<16x1xf32>
    %300 = arith.divf %298, %299 : vector<16x1xf32>
    %301 = vector.broadcast %293 : vector<16x1xf32> to vector<16x32xf32>
    %302 = arith.subf %289, %301 : vector<16x32xf32>
    %cst_95 = arith.constant 9.99999974E-6 : f32
    %303 = vector.broadcast %cst_95 : f32 to vector<16x1xf32>
    %304 = arith.addf %300, %303 : vector<16x1xf32>
    %305 = math.rsqrt %304 : vector<16x1xf32>
    %306 = vector.broadcast %305 : vector<16x1xf32> to vector<16x32xf32>
    %307 = arith.mulf %302, %306 : vector<16x32xf32>
    %308 = vector.broadcast %192 : vector<1x32xf32> to vector<16x32xf32>
    %309 = arith.mulf %307, %308 : vector<16x32xf32>
    %310 = vector.broadcast %193 : vector<1x32xf32> to vector<16x32xf32>
    %311 = arith.addf %309, %310 : vector<16x32xf32>
    %c0_96 = arith.constant 0 : index
    %c0_97 = arith.constant 0 : index
    %312 = vector.load %arg8[%c0_96, %c0_97] : memref<16x32xf32, #tpu.memory_space<vmem>>, vector<16x32xf32>
    tpu.vector_store %arg8[%c0_96, %c0_97], %311 {strides = array<i32>} : memref<16x32xf32, #tpu.memory_space<vmem>>, vector<16x32xf32>,
    return
  }
  func.func @transform_0(%arg0: i32) -> (i32, i32) {
    %c0_i32 = arith.constant 0 : i32
    %c0_i32_0 = arith.constant 0 : i32
    %c0_i32_1 = arith.constant 0 : i32
    return %c0_i32, %c0_i32_0 : i32, i32
  }
  func.func @transform_1(%arg0: i32) -> (i32, i32, i32) {
    %c0_i32 = arith.constant 0 : i32
    %c0_i32_0 = arith.constant 0 : i32
    %c0_i32_1 = arith.constant 0 : i32
    %c0_i32_2 = arith.constant 0 : i32
    return %c0_i32, %c0_i32_0, %c0_i32_1 : i32, i32, i32
  }
  func.func @transform_2(%arg0: i32) -> (i32, i32, i32) {
    %c0_i32 = arith.constant 0 : i32
    %c0_i32_0 = arith.constant 0 : i32
    %c0_i32_1 = arith.constant 0 : i32
    %c0_i32_2 = arith.constant 0 : i32
    return %c0_i32, %c0_i32_0, %c0_i32_1 : i32, i32, i32
  }
  func.func @transform_3(%arg0: i32) -> (i32, i32, i32) {
    %c0_i32 = arith.constant 0 : i32
    %c0_i32_0 = arith.constant 0 : i32
    %c0_i32_1 = arith.constant 0 : i32
    %c0_i32_2 = arith.constant 0 : i32
    return %c0_i32, %c0_i32_0, %c0_i32_1 : i32, i32, i32
  }
  func.func @transform_4(%arg0: i32) -> (i32, i32, i32) {
    %c0_i32 = arith.constant 0 : i32
    %c0_i32_0 = arith.constant 0 : i32
    %c0_i32_1 = arith.constant 0 : i32
    %c0_i32_2 = arith.constant 0 : i32
    return %c0_i32, %c0_i32_0, %c0_i32_1 : i32, i32, i32
  }
  func.func @transform_5(%arg0: i32) -> (i32, i32, i32) {
    %c0_i32 = arith.constant 0 : i32
    %c0_i32_0 = arith.constant 0 : i32
    %c0_i32_1 = arith.constant 0 : i32
    %c0_i32_2 = arith.constant 0 : i32
    return %c0_i32, %c0_i32_0, %c0_i32_1 : i32, i32, i32
  }
  func.func @transform_6(%arg0: i32) -> (i32, i32, i32) {
    %c0_i32 = arith.constant 0 : i32
    %c0_i32_0 = arith.constant 0 : i32
    %c0_i32_1 = arith.constant 0 : i32
    %c0_i32_2 = arith.constant 0 : i32
    return %c0_i32, %c0_i32_0, %c0_i32_1 : i32, i32, i32
  }
  func.func @transform_7(%arg0: i32) -> (i32, i32) {
    %c0_i32 = arith.constant 0 : i32
    %c0_i32_0 = arith.constant 0 : i32
    %c0_i32_1 = arith.constant 0 : i32
    return %c0_i32, %c0_i32_0 : i32, i32
  }
}

</mosaic_0001>

<bundles_post_ra>
// kernel: transformer_encoder.1
= control target key start
LH: loop header
LB: loop body
LE: loop exit
PB: predicated region body
PF: predicated region fallthrough
CT: control target
= control target key end

     0   :  { %s2252_s0 = inlined_call_operand.vmem [shape: f32[16,32], index: 0, kind: input, shape index: {}]   ;;  %s2253_s1 = inlined_call_operand.vmem [shape: bf16[2,32,96], index: 1, kind: input, shape index: {}]   ;;  %s2254_s2 = inlined_call_operand.vmem [shape: bf16[2,32,32], index: 2, kind: input, shape index: {}]   ;;  %s2255_s3 = inlined_call_operand.vmem [shape: bf16[2,32,128], index: 3, kind: input, shape index: {}]   ;;  %s2256_s4 = inlined_call_operand.vmem [shape: bf16[2,128,32], index: 4, kind: input, shape index: {}]   ;;  %s2257_s5 = inlined_call_operand.vmem [shape: f32[2,2,128], index: 5, kind: input, shape index: {}]   ;;  %s2258_s6 = inlined_call_operand.vmem [shape: f32[2,6,32], index: 6, kind: input, shape index: {}]   ;;  %s2259_s7 = inlined_call_operand.hbm [shape: f32[16,32], index: 7, kind: output, shape index: {}]  }
   0x1   :  { %v1605_v0 = vld [vmem:[%s2253_s1 + $0x8] sm:$0xff] }
   0x2   :  { %12 = vsyncpa [#allocation3], 0  ;;  %211 = vmatpush.bf16.msra.mxu1 %v1605_v0  ;;  %v1604_v1 = vld [vmem:[%s2253_s1] sm:$0xff]  ;;  %v1858_v3 = vld [vmem:[%s2252_s0 + $0x8] sm:$0xff]  ;;  %vm201_vm0 = vcmask 261120   ;;  %s1788_s11 = smov 120   ;;  %v30_v23 = vlaneseq }
   0x3   :  { %v1853_v2 = vld [vmem:[%s2252_s0] sm:$0xff]  ;;  %s1787_s0 = smov 72   ;;  %s1789_s12 = smov 88   ;;  %vm223_vm1 = vcmask 64512   ;;  %vm2261_vm3 = vcmask 130048   ;;  %vm2260_vm11 = vcmask 195584  }
   0x4   :  { %v187_v4 = vpack.c.bf16 %v1858_v3, %v1853_v2  ;;  %v1866_v6 = vld [vmem:[%s2257_s5] sm:$0x3]  ;;  %s1790_s13 = smov 104   ;;  %s1791_s14 = smov 112   ;;  %v31_v24 = vshrl.u32 %v30_v23, 7  ;;  %v40_v26 = vand.u32 127, %v30_v23 }
   0x5   :  { %v188_v7 = vperm.slane %v1866_v6, 0  ;;  %s1792_s15 = smov 80   ;;  %s1793_s16 = smov 96  }
   0x6   :  { %212 = vmatpush.bf16.msra.mxu1 %v1604_v1  ;;  %v33_v25 = vadd.s32 16, %v31_v24  ;;  %v37_v28 = vadd.s32 48, %v31_v24  ;;  %v141_v29 = vand.u32 1, %v40_v26  ;;  %v34_v31 = vadd.s32 24, %v31_v24  ;;  %s1794_s17 = smov 48   ;;  %s1795_s18 = smov 56  }
   0x7   :  { %v35_v32 = vadd.s32 32, %v31_v24  ;;  %v36_v43 = vadd.s32 40, %v31_v24  ;;  %v32_v47 = vadd.s32 8, %v31_v24  ;;  %v45_v50 = vand.u32 1, %v31_v24  ;;  %s1796_s19 = smov 40   ;;  %s1797_s20 = smov 64  }
   0x8   :  { %v59_v27 = vand.u32 1, %v33_v25  ;;  %v87_v33 = vand.u32 1, %v37_v28  ;;  %v66_v37 = vand.u32 1, %v34_v31  ;;  %v38_v56 = vadd.s32 56, %v31_v24  ;;  %s1798_s21 = smov 8   ;;  %s1799_s22 = smov 16  }
   0x9   :  { %1448 = vmatmul.msk.bf16.vlgmr.msra.gmra.mxu1 %vm201_vm0, %v187_v4  ;;  %v73_v38 = vand.u32 1, %v35_v32  ;;  %v80_v55 = vand.u32 1, %v36_v43  ;;  %v52_v57 = vand.u32 1, %v32_v47  ;;  %vm1922_vm7 = vcmp.eq.s32.totalorder %v45_v50, %v141_v29  ;;  %s1800_s23 = smov 24  }
   0xa   :  { %vm1894_vm2 = vcmp.eq.s32.totalorder %v59_v27, %v141_v29  ;;  %vm1901_vm4 = vcmp.eq.s32.totalorder %v87_v33, %v141_v29  ;;  %vm1905_vm5 = vcmp.eq.s32.totalorder %v66_v37, %v141_v29  ;;  %v94_v60 = vand.u32 1, %v38_v56 }
   0xb   :  { %vm1909_vm6 = vcmp.eq.s32.totalorder %v73_v38, %v141_v29  ;;  %vm1926_vm8 = vcmp.eq.s32.totalorder %v80_v55, %v141_v29  ;;  %vm1934_vm9 = vcmp.eq.s32.totalorder %v52_v57, %v141_v29 }
   0xc   :  { %vm1947_vm10 = vcmp.eq.s32.totalorder %v94_v60, %v141_v29 }
  0x86   :  { %v214_v5 = vpop.f32.mrf.mxu1 }
  0x87   :  { %v215_v9 = vadd.f32 %v214_v5, %v188_v7 }
  0x8e   :  { %v216_v8 = vpop.f32.mrf.mxu1 }
  0x8f   :  { %v217_v10 = vadd.f32 %v216_v8, %v188_v7 }
  0x91   :  { %v1869_v11 = vpack.c.bf16 %v217_v10, %v215_v9 }
  0x93   :  { %294 = vrot.lane.b32.xlu2 %v1869_v11, %s1787_s0  ;;  %244 = vrot.lane.b32.xlu1 %v1869_v11, %s1788_s11 }
  0x94   :  { %246 = vrot.lane.b32.xlu0 %v1869_v11, %s1789_s12 }
  0x9b   :  { %292 = vrot.lane.b32.xlu2 %v1869_v11, %s1790_s13  ;;  %268 = vrot.lane.b32.xlu1 %v1869_v11, %s1791_s14 }
  0x9c   :  { %270 = vrot.lane.b32.xlu0 %v1869_v11, %s1792_s15 }
  0xa4   :  { %221 = vrot.lane.b32.xlu0 %v1869_v11, %s1793_s16 }
  0xed   :  { %v295_v12 = vpop.permute.xlu2 %294 }
  0xee   :  { %v300_v13 = vsel %vm223_vm1, %v295_v12, 0 }
  0xef   :  { %309 = vmatpush.bf16.xpose.msra.mxu0 %v300_v13 }
  0xf5   :  { %v293_v14 = vpop.permute.xlu2 %292 }
  0xf6   :  { %1452 = vmatmul.msk.bf16.vlgmr.msra.gmra.mxu0 %vm223_vm1, %v293_v14 }
 0x105   :  { %v245_v17 = vpop.permute.xlu1 %244 }
 0x106   :  { %v247_v15 = vpop.permute.xlu0 %246 }
 0x107   :  { %v252_v16 = vsel %vm223_vm1, %v247_v15, 0 }
 0x108   :  { %261 = vmatpush.bf16.xpose.msra.mxu2 %v252_v16 }
 0x10d   :  { %v269_v20 = vpop.permute.xlu1 %268 }
 0x10e   :  { %v271_v18 = vpop.permute.xlu0 %270 }
 0x10f   :  { %1450 = vmatmul.msk.bf16.vlgmr.msra.gmra.mxu2 %vm223_vm1, %v245_v17  ;;  %v276_v19 = vsel %vm223_vm1, %v271_v18, 0 }
 0x110   :  { %285 = vmatpush.bf16.xpose.msra.mxu3 %v276_v19 }
 0x116   :  { %v222_v21 = vpop.permute.xlu0 %221 }
 0x117   :  { %1451 = vmatmul.msk.bf16.vlgmr.msra.gmra.mxu3 %vm223_vm1, %v269_v20  ;;  %v228_v22 = vsel %vm223_vm1, %v222_v21, 0 }
 0x118   :  { %237 = vmatpush.bf16.xpose.msrb.mxu1 %v228_v22 }
 0x11f   :  { %1449 = vmatmul.msk.bf16.vlgmr.msrb.gmra.mxu1 %vm223_vm1, %v1869_v11 }
 0x173   :  { %v311_v40 = vpop.f32.mrf.mxu0 }
 0x174   :  { %v322_v44 = vsel %vm1901_vm4, %v311_v40, -1e+30 }
 0x175   :  { %v343_v52 = vsel %vm2261_vm3, %v322_v44, -inf }
 0x17b   :  { %v313_v9 = vpop.f32.mrf.mxu0 }
 0x17c   :  { %v323_v12 = vsel %vm1947_vm10, %v313_v9, -1e+30 }
 0x17d   :  { %v346_v13 = vsel %vm2261_vm3, %v323_v12, -inf }
 0x192   :  { %v263_v34 = vpop.f32.mrf.mxu2 }
 0x193   :  { %v318_v35 = vsel %vm1894_vm2, %v263_v34, -1e+30 }
 0x194   :  { %v331_v36 = vsel %vm2261_vm3, %v318_v35, -inf }
 0x195   :  { %332 = vmax.xlane.f32.xlu1 %v331_v36 }
 0x19a   :  { %v265_v45 = vpop.f32.mrf.mxu2  ;;  %v287_v46 = vpop.f32.mrf.mxu3 }
 0x19b   :  { %v319_v48 = vsel %vm1905_vm5, %v265_v45, -1e+30  ;;  %v320_v49 = vsel %vm1909_vm6, %v287_v46, -1e+30 }
 0x19c   :  { %v239_v51 = vpop.f32.mrf.mxu1  ;;  %v334_v53 = vsel %vm2261_vm3, %v319_v48, -inf  ;;  %v337_v54 = vsel %vm2261_vm3, %v320_v49, -inf }
 0x19d   :  { %344 = vmax.xlane.f32.xlu1 %v343_v52  ;;  %335 = vmax.xlane.f32.xlu2 %v334_v53  ;;  %v1932_v61 = vsel %vm1922_vm7, %v239_v51, -1e+30 }
 0x19e   :  { %338 = vmax.xlane.f32.xlu0 %v337_v54  ;;  %v325_v7 = vsel %vm2261_vm3, %v1932_v61, -inf }
 0x1a2   :  { %v289_v62 = vpop.f32.mrf.mxu3 }
 0x1a3   :  { %v321_v0 = vsel %vm1926_vm8, %v289_v62, -1e+30 }
 0x1a4   :  { %v241_v1 = vpop.f32.mrf.mxu1  ;;  %v340_v4 = vsel %vm2261_vm3, %v321_v0, -inf }
 0x1a5   :  { %v1943_v5 = vsel %vm1934_vm9, %v241_v1, -1e+30  ;;  %341 = vmax.xlane.f32.xlu2 %v340_v4 }
 0x1a6   :  { %326 = vmax.xlane.f32.xlu0 %v325_v7  ;;  %v328_v10 = vsel %vm2261_vm3, %v1943_v5, -inf }
 0x1a7   :  { %329 = vmax.xlane.f32.xlu1 %v328_v10 }
 0x1ad   :  { %347 = vmax.xlane.f32.xlu2 %v346_v13 }
 0x208   :  { %v333_v14 = vpop.xlane.xlu1 %332 }
 0x209   :  { %v351_v15 = vsub.f32 %v318_v35, %v333_v14 }
 0x20b   :  { %v361_v16 = vmul.f32 1.442695, %v351_v15 }
 0x20d   :  { %1679 = vpow2.f32 %v361_v16 }
 0x210   :  { %v345_v17 = vpop.xlane.xlu1 %344  ;;  %v336_v18 = vpop.xlane.xlu2 %335 }
 0x211   :  { %v355_v19 = vsub.f32 %v322_v44, %v345_v17  ;;  %v339_v20 = vpop.xlane.xlu0 %338  ;;  %v352_v24 = vsub.f32 %v319_v48, %v336_v18 }
 0x212   :  { %v353_v21 = vsub.f32 %v320_v49, %v339_v20 }
 0x213   :  { %v1956_v22 = vpop.eup %1679  ;;  %v369_v23 = vmul.f32 1.442695, %v355_v19  ;;  %v363_v27 = vmul.f32 1.442695, %v352_v24 }
 0x214   :  { %v365_v25 = vmul.f32 1.442695, %v353_v21  ;;  %v379_v26 = vsel %vm2261_vm3, %v1956_v22, 0.0 }
 0x215   :  { %1681 = vpow2.f32 %v369_v23  ;;  %380 = vadd.xlane.f32.xlu2 %v379_v26 }
 0x216   :  { %1683 = vpow2.f32 %v365_v25 }
 0x217   :  { %1685 = vpow2.f32 %v363_v27 }
 0x218   :  { %v342_v28 = vpop.xlane.xlu2 %341 }
 0x219   :  { %v354_v29 = vsub.f32 %v321_v0, %v342_v28  ;;  %v327_v48 = vpop.xlane.xlu0 %326 }
 0x21a   :  { %v349_v49 = vsub.f32 %v1932_v61, %v327_v48  ;;  %v330_v50 = vpop.xlane.xlu1 %329 }
 0x21b   :  { %v1960_v31 = vpop.eup %1681  ;;  %v367_v32 = vmul.f32 1.442695, %v354_v29  ;;  %v350_v51 = vsub.f32 %v1943_v5, %v330_v50 }
 0x21c   :  { %v391_v33 = vsel %vm2261_vm3, %v1960_v31, 0.0  ;;  %v1684_v34 = vpop.eup %1683  ;;  %v357_v52 = vmul.f32 1.442695, %v349_v49 }
 0x21d   :  { %1687 = vpow2.f32 %v367_v32  ;;  %392 = vadd.xlane.f32.xlu0 %v391_v33  ;;  %v385_v35 = vsel %vm2261_vm3, %v1684_v34, 0.0  ;;  %v1686_v37 = vpop.eup %1685  ;;  %v359_v53 = vmul.f32 1.442695, %v350_v51 }
 0x21e   :  { %386 = vadd.xlane.f32.xlu1 %v385_v35  ;;  %v382_v45 = vsel %vm2261_vm3, %v1686_v37, 0.0 }
 0x220   :  { %v348_v36 = vpop.xlane.xlu2 %347 }
 0x221   :  { %v356_v38 = vsub.f32 %v323_v12, %v348_v36 }
 0x223   :  { %v1688_v40 = vpop.eup %1687  ;;  %v371_v43 = vmul.f32 1.442695, %v356_v38 }
 0x224   :  { %v388_v44 = vsel %vm2261_vm3, %v1688_v40, 0.0 }
 0x225   :  { %1689 = vpow2.f32 %v371_v43  ;;  %389 = vadd.xlane.f32.xlu2 %v388_v44  ;;  %383 = vadd.xlane.f32.xlu0 %v382_v45 }
 0x226   :  { %1691 = vpow2.f32 %v357_v52 }
 0x227   :  { %1693 = vpow2.f32 %v359_v53 }
 0x22b   :  { %v1690_v46 = vpop.eup %1689 }
 0x22c   :  { %v394_v47 = vsel %vm2261_vm3, %v1690_v46, 0.0  ;;  %v1692_v54 = vpop.eup %1691 }
 0x22d   :  { %395 = vadd.xlane.f32.xlu1 %v394_v47  ;;  %v1978_v55 = vpop.eup %1693  ;;  %v373_v56 = vsel %vm2261_vm3, %v1692_v54, 0.0 }
 0x22e   :  { %v376_v57 = vsel %vm2261_vm3, %v1978_v55, 0.0 }
 0x239   :  { %476 = vrot.lane.b32.xlu0 %v1869_v11, %s1794_s17 }
 0x23d   :  { %451 = vrot.lane.b32.xlu2 %v1869_v11, %s1795_s18 }
 0x246   :  { %501 = vrot.lane.b32.xlu1 %v1869_v11, %s1796_s19 }
 0x24e   :  { %426 = vrot.lane.b32.xlu1 %v1869_v11, %s1797_s20 }
 0x263   :  { %374 = vadd.xlane.f32.xlu0 %v373_v56 }
 0x266   :  { %377 = vadd.xlane.f32.xlu2 %v376_v57 }
 0x288   :  { %v381_v11 = vpop.xlane.xlu2 %380 }
 0x289   :  { %1695 = vrcp.f32 %v381_v11 }
 0x28f   :  { %v1696_v1 = vpop.eup %1695 }
 0x290   :  { %v393_v60 = vpop.xlane.xlu0 %392  ;;  %v407_v4 = vmul.f32 %v1696_v1, %v1956_v22  ;;  %v1606_v1 = vld [vmem:[%s2254_s2] sm:$0xff] }
 0x291   :  { %v387_v61 = vpop.xlane.xlu1 %386 }
 0x292   :  { %1697 = vrcp.f32 %v387_v61  ;;  %v415_v12 = vpack.c.bf16 %v407_v4, %v407_v4 }
 0x294   :  { %v448_v18 = vunpack.c.l.b16 %v415_v12 }
 0x298   :  { %v390_v62 = vpop.xlane.xlu2 %389  ;;  %v384_v0 = vpop.xlane.xlu0 %383 }
 0x299   :  { %1699 = vrcp.f32 %v390_v62  ;;  %v1698_v5 = vpop.eup %1697 }
 0x29a   :  { %1701 = vrcp.f32 %v384_v0  ;;  %v409_v16 = vmul.f32 %v1698_v5, %v1684_v34  ;;  %v1607_v0 = vld [vmem:[%s2254_s2 + $0x8] sm:$0xff] }
 0x29c   :  { %v417_v21 = vpack.c.bf16 %v409_v16, %v409_v16 }
 0x29e   :  { %v473_v25 = vunpack.c.l.b16 %v417_v21 }
 0x29f   :  { %v1700_v7 = vpop.eup %1699 }
 0x2a0   :  { %v1702_v9 = vpop.eup %1701  ;;  %v452_v10 = vpop.permute.xlu2 %451  ;;  %v410_v13 = vmul.f32 %v1700_v7, %v1688_v40 }
 0x2a1   :  { %v408_v14 = vmul.f32 %v1702_v9, %v1686_v37  ;;  %464 = vmatpush.bf16.msrb.mxu2 %v452_v10  ;;  %v396_v15 = vpop.xlane.xlu1 %395 }
 0x2a2   :  { %v418_v19 = vpack.c.bf16 %v410_v13, %v410_v13  ;;  %1703 = vrcp.f32 %v396_v15 }
 0x2a3   :  { %v416_v17 = vpack.c.bf16 %v408_v14, %v408_v14  ;;  %1705 = vrcp.f32 %v393_v60 }
 0x2a4   :  { %v474_v24 = vunpack.c.l.b16 %v418_v19 }
 0x2a5   :  { %v449_v20 = vunpack.c.l.b16 %v416_v17 }
 0x2a6   :  { %v475_v28 = vpack.c.b16 %v474_v24, %v473_v25  ;;  %v2009_v25 = vld [vmem:[%s2258_s6] sm:$0x3f] }
 0x2a7   :  { %v450_v23 = vpack.c.b16 %v449_v20, %v448_v18 }
 0x2a8   :  { %v1704_v22 = vpop.eup %1703 }
 0x2a9   :  { %1454 = vmatmul.msk.bf16.vlgmr.msrb.gmra.mxu2 %vm2261_vm3, %v450_v23  ;;  %v1706_v27 = vpop.eup %1705  ;;  %v412_v29 = vmul.f32 %v1704_v22, %v1690_v46 }
 0x2aa   :  { %v411_v32 = vmul.f32 %v1706_v27, %v1960_v31 }
 0x2ab   :  { %v477_v26 = vpop.permute.xlu0 %476  ;;  %v420_v33 = vpack.c.bf16 %v412_v29, %v412_v29 }
 0x2ac   :  { %489 = vmatpush.bf16.msrb.mxu3 %v477_v26  ;;  %v419_v34 = vpack.c.bf16 %v411_v32, %v411_v32  ;;  %v553_v26 = vperm.slane %v2009_v25, 0 }
 0x2ad   :  { %v499_v35 = vunpack.c.l.b16 %v420_v33 }
 0x2ae   :  { %v498_v36 = vunpack.c.l.b16 %v419_v34 }
 0x2af   :  { %1455 = vmatmul.msk.bf16.vlgmr.msrb.gmra.mxu3 %vm2261_vm3, %v475_v28 }
 0x2b0   :  { %v500_v38 = vpack.c.b16 %v499_v35, %v498_v36 }
 0x2b8   :  { %v502_v37 = vpop.permute.xlu1 %501 }
 0x2b9   :  { %514 = vmatpush.bf16.msrb.mxu0 %v502_v37  ;;  %v1801_v37 = vmov 32.0  }
 0x2bc   :  { %1456 = vmatmul.msk.bf16.vlgmr.msrb.gmra.mxu0 %vm2261_vm3, %v500_v38 }
 0x2c0   :  { %v427_v40 = vpop.permute.xlu1 %426 }
 0x2c1   :  { %439 = vmatpush.bf16.msra.mxu1 %v427_v40 }
 0x2c5   :  { %575 = vmatpush.bf16.msrb.mxu1 %v1607_v0  ;;  %v1616_v0 = vld [vmem:[%s2256_s4 + $0x30] sm:$0xff] }
 0x2c9   :  { %576 = vmatpush.bf16.msrb.mxu1 %v1606_v1 }
 0x2d6   :  { %v375_v43 = vpop.xlane.xlu0 %374 }
 0x2d7   :  { %1707 = vrcp.f32 %v375_v43 }
 0x2d9   :  { %v378_v44 = vpop.xlane.xlu2 %377 }
 0x2da   :  { %1709 = vrcp.f32 %v378_v44 }
 0x2db   :  { %1711 = vrcp.f32 %v1801_v37  ;;  %v1611_v37 = vld [vmem:[%s2256_s4 + $0x8] sm:$0xff] }
 0x2dd   :  { %v1708_v45 = vpop.eup %1707 }
 0x2de   :  { %v405_v46 = vmul.f32 %v1708_v45, %v1692_v54 }
 0x2e0   :  { %v1710_v47 = vpop.eup %1709  ;;  %v413_v48 = vpack.c.bf16 %v405_v46, %v405_v46 }
 0x2e1   :  { %v406_v31 = vmul.f32 %v1710_v47, %v1978_v55  ;;  %v1712_v38 = vpop.eup %1711 }
 0x2e2   :  { %v423_v50 = vunpack.c.l.b16 %v413_v48  ;;  %v592_v40 = vmul.f32 32.0, %v1712_v38  ;;  %vm596_vm12 = vweird.f32 %v1712_v38 }
 0x2e3   :  { %v414_v49 = vpack.c.bf16 %v406_v31, %v406_v31 }
 0x2e4   :  { %v593_v43 = vsub.f32 1.0, %v592_v40 }
 0x2e5   :  { %v424_v51 = vunpack.c.l.b16 %v414_v49 }
 0x2e6   :  { %v594_v44 = vmul.f32 %v1712_v38, %v593_v43  ;;  %v643_v43 = vperm.slane %v1866_v6, 1 }
 0x2e7   :  { %v425_v52 = vpack.c.b16 %v424_v51, %v423_v50 }
 0x2e8   :  { %v595_v45 = vadd.f32 %v1712_v38, %v594_v44 }
 0x2e9   :  { %1453 = vmatmul.msk.bf16.vlgmr.msra.gmra.mxu1 %vm2261_vm3, %v425_v52 }
 0x2ea   :  { %v2016_v46 = vsel %vm596_vm12, %v1712_v38, %v595_v45  ;;  %v1610_v38 = vld [vmem:[%s2256_s4] sm:$0xff] }
 0x32c   :  { %v466_v53 = vpop.f32.mrf.mxu2 }
 0x332   :  { %v491_v56 = vpop.f32.mrf.mxu3 }
 0x334   :  { %v468_v57 = vpop.f32.mrf.mxu2 }
 0x335   :  { %v1649_v11 = vpack.i.bf16 %v468_v57, %v466_v53 }
 0x337   :  { %1650 = vrot.lane.b32.xlu1 %v1649_v11, %s1798_s21 }
 0x339   :  { %v516_v60 = vpop.f32.mrf.mxu0 }
 0x33a   :  { %v493_v61 = vpop.f32.mrf.mxu3 }
 0x33b   :  { %v1654_v54 = vpack.i.bf16 %v493_v61, %v491_v56  ;;  %v1609_v56 = vld [vmem:[%s2255_s3 + $0x8] sm:$0xff]  ;;  %v1608_v61 = vld [vmem:[%s2255_s3] sm:$0xff] }
 0x33c   :  { %665 = vmatpush.bf16.msra.mxu2 %v1609_v56 }
 0x33f   :  { %1655 = vrot.lane.b32.xlu1 %v1654_v54, %s1799_s22  ;;  %v1617_v54 = vld [vmem:[%s2256_s4 + $0x38] sm:$0xff] }
 0x340   :  { %666 = vmatpush.bf16.msra.mxu2 %v1608_v61  ;;  %725 = vmatpush.bf16.msra.mxu3 %v1617_v54 }
 0x341   :  { %v518_v55 = vpop.f32.mrf.mxu0 }
 0x342   :  { %v1659_v62 = vpack.i.bf16 %v518_v55, %v516_v60 }
 0x344   :  { %726 = vmatpush.bf16.msra.mxu3 %v1616_v0 }
 0x347   :  { %1660 = vrot.lane.b32.xlu1 %v1659_v62, %s1800_s23 }
 0x366   :  { %v441_v5 = vpop.f32.mrf.mxu1 }
 0x36e   :  { %v443_v14 = vpop.f32.mrf.mxu1 }
 0x3a9   :  { %v1651_v4 = vpop.permute.xlu1 %1650 }
 0x3aa   :  { %v1653_v9 = vunpack.i.h.bf16 %v1651_v4  ;;  %v1652_v10 = vunpack.i.l.bf16 %v1651_v4 }
 0x3ac   :  { %v545_v16 = vsel %vm223_vm1, %v441_v5, %v1652_v10  ;;  %v546_v17 = vsel %vm223_vm1, %v443_v14, %v1653_v9 }
 0x3b1   :  { %v1656_v7 = vpop.permute.xlu1 %1655 }
 0x3b2   :  { %v1658_v12 = vunpack.i.h.bf16 %v1656_v7  ;;  %v1657_v13 = vunpack.i.l.bf16 %v1656_v7  ;;  %v1615_v7 = vld [vmem:[%s2256_s4 + $0x28] sm:$0xff] }
 0x3b3   :  { %727 = vmatpush.bf16.msra.mxu3 %v1615_v7  ;;  %v1619_v7 = vld [vmem:[%s2253_s1 + $0x18] sm:$0xff] }
 0x3b4   :  { %v547_v20 = vsel %vm2261_vm3, %v545_v16, %v1657_v13  ;;  %v548_v21 = vsel %vm2261_vm3, %v546_v17, %v1658_v12  ;;  %v1614_v12 = vld [vmem:[%s2256_s4 + $0x20] sm:$0xff]  ;;  %850 = vmatpush.bf16.msra.mxu0 %v1619_v7 }
 0x3b7   :  { %728 = vmatpush.bf16.msra.mxu3 %v1614_v12 }
 0x3b9   :  { %v1661_v15 = vpop.permute.xlu1 %1660 }
 0x3ba   :  { %v1663_v18 = vunpack.i.h.bf16 %v1661_v15  ;;  %v1662_v19 = vunpack.i.l.bf16 %v1661_v15 }
 0x3bc   :  { %v550_v23 = vsel %vm2260_vm11, %v547_v20, %v1662_v19  ;;  %v551_v24 = vsel %vm2260_vm11, %v548_v21, %v1663_v18  ;;  %v636_v21 = vperm.slane %v2009_v25, 2 }
 0x3bd   :  { %v552_v22 = vpack.c.bf16 %v551_v24, %v550_v23 }
 0x3bf   :  { %1465 = vmatmul.msk.bf16.vlgmr.msrb.gmra.mxu1 %vm201_vm0, %v552_v22 }
 0x43c   :  { %v578_v27 = vpop.f32.mrf.mxu1 }
 0x43d   :  { %v579_v28 = vadd.f32 %v578_v27, %v553_v26 }
 0x43f   :  { %v583_v29 = vadd.f32 %v579_v28, %v1853_v2 }
 0x441   :  { %v585_v32 = vsel %vm201_vm0, %v583_v29, 0.0 }
 0x442   :  { %586 = vadd.xlane.f32.xlu1 %v585_v32 }
 0x444   :  { %v580_v33 = vpop.f32.mrf.mxu1 }
 0x445   :  { %v581_v34 = vadd.f32 %v580_v33, %v553_v26  ;;  %v639_v26 = vperm.slane %v2009_v25, 3 }
 0x447   :  { %v584_v35 = vadd.f32 %v581_v34, %v1858_v3 }
 0x449   :  { %v588_v36 = vsel %vm201_vm0, %v584_v35, 0.0 }
 0x44a   :  { %589 = vadd.xlane.f32.xlu0 %v588_v36  ;;  %v1612_v36 = vld [vmem:[%s2256_s4 + $0x10] sm:$0xff] }
 0x4b5   :  { %v587_v2 = vpop.xlane.xlu1 %586 }
 0x4b6   :  { %v598_v47 = vmul.f32 %v2016_v46, %v587_v2 }
 0x4b8   :  { %v600_v48 = vsub.f32 %v583_v29, %v598_v47 }
 0x4ba   :  { %v602_v31 = vmul.f32 %v600_v48, %v600_v48 }
 0x4bc   :  { %v604_v3 = vsel %vm201_vm0, %v602_v31, 0.0 }
 0x4bd   :  { %v590_v49 = vpop.xlane.xlu0 %589  ;;  %605 = vadd.xlane.f32.xlu2 %v604_v3  ;;  %v676_v3 = vperm.slane %v2009_v25, 1 }
 0x4be   :  { %v599_v50 = vmul.f32 %v2016_v46, %v590_v49 }
 0x4c0   :  { %v601_v51 = vsub.f32 %v584_v35, %v599_v50  ;;  %v1613_v35 = vld [vmem:[%s2256_s4 + $0x18] sm:$0xff] }
 0x4c1   :  { %729 = vmatpush.bf16.msra.mxu3 %v1613_v35 }
 0x4c2   :  { %v603_v52 = vmul.f32 %v601_v51, %v601_v51 }
 0x4c4   :  { %v607_v53 = vsel %vm201_vm0, %v603_v52, 0.0 }
 0x4c5   :  { %608 = vadd.xlane.f32.xlu0 %v607_v53  ;;  %730 = vmatpush.bf16.msra.mxu3 %v1612_v36  ;;  %v788_v36 = vperm.slane %v2009_v25, 5 }
 0x4c9   :  { %731 = vmatpush.bf16.msra.mxu3 %v1611_v37 }
 0x4cd   :  { %732 = vmatpush.bf16.msra.mxu3 %v1610_v38 }
 0x530   :  { %v606_v57 = vpop.xlane.xlu2 %605 }
 0x531   :  { %v610_v11 = vmul.f32 %v606_v57, %v2016_v46 }
 0x533   :  { %v612_v60 = vadd.f32 1e-05, %v610_v11 }
 0x535   :  { %1713 = vrsqrt.f32 %v612_v60  ;;  %vm620_vm14 = vweird.f32 %v612_v60 }
 0x538   :  { %v609_v55 = vpop.xlane.xlu0 %608 }
 0x539   :  { %v611_v62 = vmul.f32 %v609_v55, %v2016_v46 }
 0x53b   :  { %v1714_v1 = vpop.eup %1713  ;;  %v613_v4 = vadd.f32 1e-05, %v611_v62 }
 0x53c   :  { %v615_v5 = vmul.f32 %v1714_v1, %v612_v60  ;;  %vm621_vm13 = vweird.f32 %v1714_v1 }
 0x53d   :  { %1715 = vrsqrt.f32 %v613_v4  ;;  %vm622_vm15 = vmor %vm620_vm14, %vm621_vm13  ;;  %vm630_vm11 = vweird.f32 %v613_v4 }
 0x53e   :  { %v616_v9 = vmul.f32 %v1714_v1, %v615_v5 }
 0x540   :  { %v617_v10 = vmul.f32 0.5, %v616_v9 }
 0x542   :  { %v618_v13 = vsub.f32 1.5, %v617_v10 }
 0x543   :  { %v1716_v14 = vpop.eup %1715 }
 0x544   :  { %v619_v15 = vmul.f32 %v1714_v1, %v618_v13  ;;  %v625_v16 = vmul.f32 %v1716_v14, %v613_v4  ;;  %vm631_vm12 = vweird.f32 %v1716_v14  ;;  %v1618_v13 = vld [vmem:[%s2253_s1 + $0x10] sm:$0xff] }
 0x545   :  { %vm632_vm3 = vmor %vm630_vm11, %vm631_vm12  ;;  %851 = vmatpush.bf16.msra.mxu0 %v1618_v13 }
 0x546   :  { %v626_v17 = vmul.f32 %v1716_v14, %v625_v16  ;;  %v623_v18 = vsel %vm622_vm15, %v1714_v1, %v619_v15 }
 0x547   :  { %v634_v23 = vmul.f32 %v623_v18, %v600_v48 }
 0x548   :  { %v627_v19 = vmul.f32 0.5, %v626_v17 }
 0x549   :  { %v637_v27 = vmul.f32 %v636_v21, %v634_v23 }
 0x54a   :  { %v628_v20 = vsub.f32 1.5, %v627_v19 }
 0x54b   :  { %v640_v32 = vadd.f32 %v639_v26, %v637_v27 }
 0x54c   :  { %v629_v24 = vmul.f32 %v1716_v14, %v628_v20 }
 0x54e   :  { %v633_v22 = vsel %vm632_vm3, %v1716_v14, %v629_v24 }
 0x54f   :  { %v635_v28 = vmul.f32 %v633_v22, %v601_v51 }
 0x551   :  { %v638_v29 = vmul.f32 %v636_v21, %v635_v28 }
 0x553   :  { %v641_v33 = vadd.f32 %v639_v26, %v638_v29 }
 0x555   :  { %v642_v34 = vpack.c.bf16 %v641_v33, %v640_v32 }
 0x557   :  { %1474 = vmatmul.msk.bf16.vlgmr.msra.gmra.mxu2 %vm201_vm0, %v642_v34 }
 0x5da   :  { %v668_v40 = vpop.f32.mrf.mxu2 }
 0x5db   :  { %v669_v44 = vadd.f32 %v668_v40, %v643_v43 }
 0x5dd   :  { %v673_v47 = vmax.f32 %v669_v44, 0.0 }
 0x5e2   :  { %v670_v45 = vpop.f32.mrf.mxu2 }
 0x5e3   :  { %v671_v2 = vadd.f32 %v670_v45, %v643_v43 }
 0x5e5   :  { %v674_v48 = vmax.f32 %v671_v2, 0.0 }
 0x5e7   :  { %v675_v31 = vpack.c.bf16 %v674_v48, %v673_v47  ;;  %v2085_v47 = vld [vmem:[%s2257_s5 + $0x2] sm:$0x3] }
 0x5e9   :  { %733 = vmatmul.bf16.vlgmr.msra.gmra.mxu3 %v675_v31 }
 0x66c   :  { %v734_v49 = vpop.f32.mrf.mxu3 }
 0x66d   :  { %v735_v50 = vadd.f32 %v734_v49, %v676_v3 }
 0x66f   :  { %v739_v51 = vadd.f32 %v735_v50, %v640_v32  ;;  %v785_v32 = vperm.slane %v2009_v25, 4  ;;  %v828_v25 = vperm.slane %v2085_v47, 0 }
 0x671   :  { %v741_v52 = vsel %vm201_vm0, %v739_v51, 0.0 }
 0x672   :  { %742 = vadd.xlane.f32.xlu2 %v741_v52 }
 0x674   :  { %v736_v53 = vpop.f32.mrf.mxu3 }
 0x675   :  { %v737_v56 = vadd.f32 %v736_v53, %v676_v3 }
 0x677   :  { %v740_v57 = vadd.f32 %v737_v56, %v641_v33 }
 0x679   :  { %v744_v6 = vsel %vm201_vm0, %v740_v57, 0.0 }
 0x67a   :  { %745 = vadd.xlane.f32.xlu0 %v744_v6 }
 0x6e5   :  { %v743_v11 = vpop.xlane.xlu2 %742 }
 0x6e6   :  { %v747_v60 = vmul.f32 %v743_v11, %v2016_v46 }
 0x6e8   :  { %v749_v61 = vsub.f32 %v739_v51, %v747_v60 }
 0x6ea   :  { %v751_v54 = vmul.f32 %v749_v61, %v749_v61 }
 0x6ec   :  { %v753_v55 = vsel %vm201_vm0, %v751_v54, 0.0 }
 0x6ed   :  { %v746_v62 = vpop.xlane.xlu0 %745  ;;  %754 = vadd.xlane.f32.xlu2 %v753_v55 }
 0x6ee   :  { %v748_v0 = vmul.f32 %v746_v62, %v2016_v46 }
 0x6f0   :  { %v750_v1 = vsub.f32 %v740_v57, %v748_v0 }
 0x6f2   :  { %v752_v4 = vmul.f32 %v750_v1, %v750_v1 }
 0x6f4   :  { %v756_v5 = vsel %vm201_vm0, %v752_v4, 0.0 }
 0x6f5   :  { %757 = vadd.xlane.f32.xlu0 %v756_v5 }
 0x760   :  { %v755_v9 = vpop.xlane.xlu2 %754 }
 0x761   :  { %v759_v10 = vmul.f32 %v755_v9, %v2016_v46 }
 0x763   :  { %v761_v12 = vadd.f32 1e-05, %v759_v10 }
 0x765   :  { %1717 = vrsqrt.f32 %v761_v12  ;;  %vm769_vm11 = vweird.f32 %v761_v12 }
 0x768   :  { %v758_v14 = vpop.xlane.xlu0 %757 }
 0x769   :  { %v760_v15 = vmul.f32 %v758_v14, %v2016_v46 }
 0x76b   :  { %v1718_v16 = vpop.eup %1717  ;;  %v762_v17 = vadd.f32 1e-05, %v760_v15 }
 0x76c   :  { %v764_v18 = vmul.f32 %v1718_v16, %v761_v12  ;;  %vm770_vm3 = vweird.f32 %v1718_v16 }
 0x76d   :  { %1719 = vrsqrt.f32 %v762_v17  ;;  %vm771_vm13 = vmor %vm769_vm11, %vm770_vm3  ;;  %vm779_vm15 = vweird.f32 %v762_v17  ;;  %vm2278_vm3 = vcmask 130048  }
 0x76e   :  { %v765_v19 = vmul.f32 %v1718_v16, %v764_v18  ;;  %vm2279_vm11 = vmmov %vm2278_vm3 }
 0x770   :  { %v766_v20 = vmul.f32 0.5, %v765_v19 }
 0x772   :  { %v767_v21 = vsub.f32 1.5, %v766_v20 }
 0x773   :  { %v1720_v23 = vpop.eup %1719 }
 0x774   :  { %v768_v24 = vmul.f32 %v1718_v16, %v767_v21  ;;  %v774_v22 = vmul.f32 %v1720_v23, %v762_v17  ;;  %vm780_vm14 = vweird.f32 %v1720_v23 }
 0x775   :  { %vm781_vm12 = vmor %vm779_vm15, %vm780_vm14 }
 0x776   :  { %v775_v26 = vmul.f32 %v1720_v23, %v774_v22  ;;  %v772_v27 = vsel %vm771_vm13, %v1718_v16, %v768_v24  ;;  %vm2281_vm13 = vmmov %vm2278_vm3 }
 0x777   :  { %v783_v33 = vmul.f32 %v772_v27, %v749_v61 }
 0x778   :  { %v776_v28 = vmul.f32 0.5, %v775_v26 }
 0x779   :  { %v786_v37 = vmul.f32 %v785_v32, %v783_v33 }
 0x77a   :  { %v777_v29 = vsub.f32 1.5, %v776_v28 }
 0x77b   :  { %v2075_v43 = vadd.f32 %v788_v36, %v786_v37 }
 0x77c   :  { %v778_v34 = vmul.f32 %v1720_v23, %v777_v29 }
 0x77e   :  { %v782_v35 = vsel %vm781_vm12, %v1720_v23, %v778_v34 }
 0x77f   :  { %v784_v38 = vmul.f32 %v782_v35, %v750_v1 }
 0x781   :  { %v787_v40 = vmul.f32 %v785_v32, %v784_v38 }
 0x783   :  { %v2077_v44 = vadd.f32 %v788_v36, %v787_v40 }
 0x785   :  { %v827_v45 = vpack.c.bf16 %v2077_v44, %v2075_v43 }
 0x787   :  { %1545 = vmatmul.msk.bf16.vlgmr.msra.gmra.mxu0 %vm201_vm0, %v827_v45 }
 0x804   :  { %v853_v2 = vpop.f32.mrf.mxu0 }
 0x805   :  { %v854_v31 = vadd.f32 %v853_v2, %v828_v25 }
 0x80c   :  { %v855_v48 = vpop.f32.mrf.mxu0 }
 0x80d   :  { %v856_v3 = vadd.f32 %v855_v48, %v828_v25 }
 0x80f   :  { %v2088_v49 = vpack.c.bf16 %v856_v3, %v854_v31 }
 0x811   :  { %882 = vrot.lane.b32.xlu1 %v2088_v49, %s1788_s11  ;;  %884 = vrot.lane.b32.xlu0 %v2088_v49, %s1789_s12  ;;  %s1803_s11 = smov 128  }
 0x812   :  { %860 = vrot.lane.b32.xlu2 %v2088_v49, %s1793_s16 }
 0x819   :  { %932 = vrot.lane.b32.xlu0 %v2088_v49, %s1787_s0  ;;  %s1428_s0 = sshll.u32 %s2259_s7, 4  ;;  %s1429_s0 = int_to_ptr.hbm [resolvable:$true] %s1428_s0 }
 0x81a   :  { %908 = vrot.lane.b32.xlu2 %v2088_v49, %s1792_s15 }
 0x821   :  { %930 = vrot.lane.b32.xlu0 %v2088_v49, %s1790_s13 }
 0x822   :  { %906 = vrot.lane.b32.xlu2 %v2088_v49, %s1791_s14 }
 0x86c   :  { %v861_v50 = vpop.permute.xlu2 %860 }
 0x86d   :  { %v866_v51 = vsel %vm223_vm1, %v861_v50, 0 }
 0x86e   :  { %875 = vmatpush.bf16.xpose.msra.mxu1 %v866_v51 }
 0x874   :  { %v909_v52 = vpop.permute.xlu2 %908 }
 0x875   :  { %v914_v53 = vsel %vm223_vm1, %v909_v52, 0  ;;  %1546 = vmatmul.msk.bf16.vlgmr.msra.gmra.mxu1 %vm223_vm1, %v2088_v49 }
 0x876   :  { %923 = vmatpush.bf16.xpose.msrb.mxu0 %v914_v53 }
 0x87c   :  { %v907_v56 = vpop.permute.xlu2 %906 }
 0x87d   :  { %1548 = vmatmul.msk.bf16.vlgmr.msrb.gmra.mxu0 %vm223_vm1, %v907_v56 }
 0x883   :  { %v885_v57 = vpop.permute.xlu0 %884  ;;  %v883_v11 = vpop.permute.xlu1 %882 }
 0x884   :  { %v890_v6 = vsel %vm223_vm1, %v885_v57, 0 }
 0x885   :  { %899 = vmatpush.bf16.xpose.msrb.mxu2 %v890_v6 }
 0x88b   :  { %v933_v60 = vpop.permute.xlu0 %932 }
 0x88c   :  { %v938_v61 = vsel %vm223_vm1, %v933_v60, 0  ;;  %1547 = vmatmul.msk.bf16.vlgmr.msrb.gmra.mxu2 %vm223_vm1, %v883_v11 }
 0x88d   :  { %947 = vmatpush.bf16.xpose.msrb.mxu1 %v938_v61 }
 0x893   :  { %v931_v54 = vpop.permute.xlu0 %930 }
 0x894   :  { %1549 = vmatmul.msk.bf16.vlgmr.msrb.gmra.mxu1 %vm223_vm1, %v931_v54 }
 0x8f2   :  { %v877_v1 = vpop.f32.mrf.mxu1 }
 0x8f3   :  { %v954_v59 = vsel %vm1922_vm7, %v877_v1, -1e+30 }
 0x8fa   :  { %v925_v55 = vpop.f32.mrf.mxu0  ;;  %v879_v4 = vpop.f32.mrf.mxu1 }
 0x8fb   :  { %v958_v62 = vsel %vm1909_vm6, %v925_v55, -1e+30  ;;  %vm2280_vm6 = vmmov %vm2278_vm3  ;;  %v955_v8 = vsel %vm1934_vm9, %v879_v4, -1e+30 }
 0x8fc   :  { %v974_v0 = vsel %vm2278_vm3, %v958_v62, -inf }
 0x8fd   :  { %975 = vmax.xlane.f32.xlu0 %v974_v0 }
 0x902   :  { %v927_v12 = vpop.f32.mrf.mxu0 }
 0x903   :  { %v959_v13 = vsel %vm1926_vm8, %v927_v12, -1e+30 }
 0x904   :  { %v977_v17 = vsel %vm2281_vm13, %v959_v13, -inf }
 0x90f   :  { %v901_v5 = vpop.f32.mrf.mxu2 }
 0x910   :  { %v956_v7 = vsel %vm1894_vm2, %v901_v5, -1e+30  ;;  %vm2282_vm2 = vmmov %vm2278_vm3 }
 0x911   :  { %v949_v9 = vpop.f32.mrf.mxu1  ;;  %v968_v10 = vsel %vm2279_vm11, %v956_v7, -inf  ;;  %vm2284_vm8 = vmmov %vm2282_vm2 }
 0x912   :  { %969 = vmax.xlane.f32.xlu1 %v968_v10  ;;  %v960_v41 = vsel %vm1901_vm4, %v949_v9, -1e+30  ;;  %v962_v20 = vsel %vm2284_vm8, %v954_v59, -inf  ;;  %vm2286_vm4 = vmmov %vm2282_vm2 }
 0x913   :  { %vm2287_vm7 = vmmov %vm2282_vm2 }
 0x914   :  { %vm2288_vm9 = vmmov %vm2282_vm2 }
 0x915   :  { %vm2289_vm14 = vmmov %vm2282_vm2 }
 0x916   :  { %vm2290_vm15 = vmmov %vm2282_vm2 }
 0x917   :  { %v903_v14 = vpop.f32.mrf.mxu2  ;;  %vm2291_vm12 = vmmov %vm2282_vm2 }
 0x918   :  { %v957_v42 = vsel %vm1905_vm5, %v903_v14, -1e+30  ;;  %vm2283_vm5 = vmmov %vm2282_vm2 }
 0x919   :  { %v951_v15 = vpop.f32.mrf.mxu1  ;;  %v971_v16 = vsel %vm2280_vm6, %v957_v42, -inf  ;;  %v980_v19 = vsel %vm2283_vm5, %v960_v41, -inf  ;;  %vm2292_vm3 = vmmov %vm2282_vm2 }
 0x91a   :  { %v961_v30 = vsel %vm1947_vm10, %v951_v15, -1e+30  ;;  %972 = vmax.xlane.f32.xlu2 %v971_v16  ;;  %978 = vmax.xlane.f32.xlu1 %v977_v17  ;;  %vm2285_vm10 = vmmov %vm2282_vm2 }
 0x91b   :  { %v983_v18 = vsel %vm2282_vm2, %v961_v30, -inf  ;;  %v965_v21 = vsel %vm2285_vm10, %v955_v8, -inf  ;;  %vm2293_vm11 = vmmov %vm2282_vm2 }
 0x91c   :  { %984 = vmax.xlane.f32.xlu0 %v983_v18  ;;  %vm2294_vm6 = vmmov %vm2282_vm2 }
 0x91d   :  { %vm2295_vm13 = vmmov %vm2282_vm2 }
 0x91e   :  { %vm2296_vm5 = vmmov %vm2282_vm2 }
 0x91f   :  { %vm2297_vm8 = vmmov %vm2282_vm2 }
 0x920   :  { %vm2298_vm10 = vmmov %vm2282_vm2 }
 0x922   :  { %981 = vmax.xlane.f32.xlu2 %v980_v19  ;;  %963 = vmax.xlane.f32.xlu1 %v962_v20 }
 0x92a   :  { %966 = vmax.xlane.f32.xlu2 %v965_v21 }
 0x970   :  { %v976_v23 = vpop.xlane.xlu0 %975 }
 0x971   :  { %v990_v24 = vsub.f32 %v958_v62, %v976_v23 }
 0x973   :  { %v1002_v22 = vmul.f32 1.442695, %v990_v24 }
 0x975   :  { %1721 = vpow2.f32 %v1002_v22 }
 0x97b   :  { %v2137_v58 = vpop.eup %1721 }
 0x97c   :  { %v1022_v39 = vsel %vm2286_vm4, %v2137_v58, 0.0  ;;  %vm2299_vm4 = vcmask 195584  }
 0x97d   :  { %1023 = vadd.xlane.f32.xlu2 %v1022_v39 }
 0x985   :  { %v970_v26 = vpop.xlane.xlu1 %969 }
 0x986   :  { %v988_v27 = vsub.f32 %v956_v7, %v970_v26 }
 0x988   :  { %v998_v28 = vmul.f32 1.442695, %v988_v27 }
 0x98a   :  { %1723 = vpow2.f32 %v998_v28 }
 0x98d   :  { %v979_v29 = vpop.xlane.xlu1 %978  ;;  %v973_v63 = vpop.xlane.xlu2 %972 }
 0x98e   :  { %v991_v32 = vsub.f32 %v959_v13, %v979_v29  ;;  %v989_v33 = vsub.f32 %v957_v42, %v973_v63 }
 0x98f   :  { %v985_v34 = vpop.xlane.xlu0 %984 }
 0x990   :  { %v1724_v35 = vpop.eup %1723  ;;  %v1004_v36 = vmul.f32 1.442695, %v991_v32  ;;  %v1000_v37 = vmul.f32 1.442695, %v989_v33  ;;  %v993_v38 = vsub.f32 %v961_v30, %v985_v34 }
 0x991   :  { %v1016_v40 = vsel %vm2287_vm7, %v1724_v35, 0.0  ;;  %vm2300_vm7 = vmmov %vm2299_vm4 }
 0x992   :  { %1725 = vpow2.f32 %v1004_v36  ;;  %v1008_v45 = vmul.f32 1.442695, %v993_v38  ;;  %1017 = vadd.xlane.f32.xlu0 %v1016_v40 }
 0x993   :  { %1727 = vpow2.f32 %v1000_v37 }
 0x994   :  { %1729 = vpow2.f32 %v1008_v45 }
 0x995   :  { %v982_v2 = vpop.xlane.xlu2 %981  ;;  %v964_v6 = vpop.xlane.xlu1 %963 }
 0x996   :  { %v992_v25 = vsub.f32 %v960_v41, %v982_v2  ;;  %v986_v11 = vsub.f32 %v954_v59, %v964_v6 }
 0x998   :  { %v2142_v48 = vpop.eup %1725  ;;  %v1006_v31 = vmul.f32 1.442695, %v992_v25  ;;  %v994_v60 = vmul.f32 1.442695, %v986_v11 }
 0x999   :  { %v1728_v3 = vpop.eup %1727  ;;  %v1025_v50 = vsel %vm2288_vm9, %v2142_v48, 0.0 }
 0x99a   :  { %v1730_v51 = vpop.eup %1729  ;;  %1026 = vadd.xlane.f32.xlu0 %v1025_v50  ;;  %v1019_v52 = vsel %vm2289_vm14, %v1728_v3, 0.0  ;;  %1731 = vpow2.f32 %v1006_v31 }
 0x99b   :  { %1020 = vadd.xlane.f32.xlu1 %v1019_v52  ;;  %v1031_v53 = vsel %vm2290_vm15, %v1730_v51, 0.0  ;;  %1733 = vpow2.f32 %v994_v60 }
 0x99c   :  { %1032 = vadd.xlane.f32.xlu2 %v1031_v53 }
 0x99d   :  { %v967_v61 = vpop.xlane.xlu2 %966 }
 0x99e   :  { %v987_v55 = vsub.f32 %v955_v8, %v967_v61 }
 0x9a0   :  { %v1732_v56 = vpop.eup %1731  ;;  %v996_v0 = vmul.f32 1.442695, %v987_v55 }
 0x9a1   :  { %v1028_v57 = vsel %vm2291_vm12, %v1732_v56, 0.0  ;;  %v2157_v54 = vpop.eup %1733 }
 0x9a2   :  { %v1010_v62 = vsel %vm2292_vm3, %v2157_v54, 0.0  ;;  %1735 = vpow2.f32 %v996_v0  ;;  %v1621_v0 = vld [vmem:[%s2254_s2 + $0x18] sm:$0xff] }
 0x9a3   :  { %1029 = vadd.xlane.f32.xlu1 %v1028_v57 }
 0x9a8   :  { %v1736_v1 = vpop.eup %1735 }
 0x9a9   :  { %v1013_v4 = vsel %vm2293_vm11, %v1736_v1, 0.0 }
 0x9ae   :  { %1088 = vrot.lane.b32.xlu0 %v2088_v49, %s1795_s18 }
 0x9b4   :  { %1138 = vrot.lane.b32.xlu2 %v2088_v49, %s1796_s19 }
 0x9bc   :  { %1113 = vrot.lane.b32.xlu1 %v2088_v49, %s1794_s17  ;;  %1063 = vrot.lane.b32.xlu2 %v2088_v49, %s1797_s20 }
 0x9d8   :  { %1011 = vadd.xlane.f32.xlu0 %v1010_v62 }
 0x9e6   :  { %1014 = vadd.xlane.f32.xlu1 %v1013_v4 }
 0x9f0   :  { %v1024_v5 = vpop.xlane.xlu2 %1023 }
 0xa05   :  { %v1018_v49 = vpop.xlane.xlu0 %1017 }
 0xa06   :  { %1737 = vrcp.f32 %v1018_v49 }
 0xa0c   :  { %v1738_v10 = vpop.eup %1737 }
 0xa0d   :  { %v1044_v16 = vmul.f32 %v1738_v10, %v1724_v35  ;;  %v1027_v17 = vpop.xlane.xlu0 %1026 }
 0xa0e   :  { %v1021_v7 = vpop.xlane.xlu1 %1020 }
 0xa0f   :  { %1739 = vrcp.f32 %v1021_v7  ;;  %v1033_v9 = vpop.xlane.xlu2 %1032  ;;  %v1052_v59 = vpack.c.bf16 %v1044_v16, %v1044_v16 }
 0xa10   :  { %1741 = vrcp.f32 %v1033_v9 }
 0xa11   :  { %v1085_v23 = vunpack.c.l.b16 %v1052_v59 }
 0xa15   :  { %v1740_v12 = vpop.eup %1739 }
 0xa16   :  { %v1045_v13 = vmul.f32 %v1740_v12, %v1728_v3  ;;  %v1030_v14 = vpop.xlane.xlu1 %1029  ;;  %v1742_v42 = vpop.eup %1741 }
 0xa17   :  { %1743 = vrcp.f32 %v1030_v14  ;;  %v1139_v15 = vpop.permute.xlu2 %1138  ;;  %v1049_v18 = vmul.f32 %v1742_v42, %v1730_v51 }
 0xa18   :  { %1151 = vmatpush.bf16.msra.mxu1 %v1139_v15  ;;  %v1053_v30 = vpack.c.bf16 %v1045_v13, %v1045_v13  ;;  %1745 = vrcp.f32 %v1027_v17 }
 0xa19   :  { %1747 = vrcp.f32 %v1024_v5  ;;  %v1057_v20 = vpack.c.bf16 %v1049_v18, %v1049_v18 }
 0xa1a   :  { %v1086_v19 = vunpack.c.l.b16 %v1053_v30 }
 0xa1b   :  { %v1136_v27 = vunpack.c.l.b16 %v1057_v20  ;;  %v2188_v20 = vld [vmem:[%s2258_s6 + $0x8] sm:$0x3f] }
 0xa1c   :  { %v1087_v26 = vpack.c.b16 %v1086_v19, %v1085_v23 }
 0xa1d   :  { %v1744_v41 = vpop.eup %1743 }
 0xa1e   :  { %v1048_v8 = vmul.f32 %v1744_v41, %v1732_v56  ;;  %v1746_v39 = vpop.eup %1745 }
 0xa1f   :  { %v1064_v21 = vpop.permute.xlu2 %1063  ;;  %v1748_v29 = vpop.eup %1747  ;;  %v1047_v63 = vmul.f32 %v1746_v39, %v2142_v48 }
 0xa20   :  { %v1056_v24 = vpack.c.bf16 %v1048_v8, %v1048_v8  ;;  %v1089_v22 = vpop.permute.xlu0 %1088  ;;  %1076 = vmatpush.bf16.msra.mxu2 %v1064_v21  ;;  %v1046_v33 = vmul.f32 %v1748_v29, %v2137_v58  ;;  %v1189_v8 = vperm.slane %v2188_v20, 0 }
 0xa21   :  { %1101 = vmatpush.bf16.msrb.mxu3 %v1089_v22  ;;  %v1055_v34 = vpack.c.bf16 %v1047_v63, %v1047_v63 }
 0xa22   :  { %v1135_v28 = vunpack.c.l.b16 %v1056_v24  ;;  %v1054_v35 = vpack.c.bf16 %v1046_v33, %v1046_v33 }
 0xa23   :  { %v1111_v36 = vunpack.c.l.b16 %v1055_v34 }
 0xa24   :  { %v1137_v32 = vpack.c.b16 %v1136_v27, %v1135_v28  ;;  %1551 = vmatmul.msk.bf16.vlgmr.msrb.gmra.mxu3 %vm2294_vm6, %v1087_v26  ;;  %v1110_v37 = vunpack.c.l.b16 %v1054_v35  ;;  %1211 = vmatpush.bf16.msrb.mxu2 %v1621_v0 }
 0xa26   :  { %1553 = vmatmul.msk.bf16.vlgmr.msra.gmra.mxu1 %vm2295_vm13, %v1137_v32  ;;  %v1112_v40 = vpack.c.b16 %v1111_v36, %v1110_v37 }
 0xa2e   :  { %v1114_v38 = vpop.permute.xlu1 %1113 }
 0xa2f   :  { %1126 = vmatpush.bf16.msra.mxu0 %v1114_v38 }
 0xa32   :  { %1552 = vmatmul.msk.bf16.vlgmr.msra.gmra.mxu0 %vm2282_vm2, %v1112_v40 }
 0xa4b   :  { %v1012_v45 = vpop.xlane.xlu0 %1011 }
 0xa4c   :  { %1749 = vrcp.f32 %v1012_v45 }
 0xa52   :  { %v1750_v25 = vpop.eup %1749 }
 0xa53   :  { %v1042_v48 = vmul.f32 %v1750_v25, %v2157_v54 }
 0xa55   :  { %v1050_v58 = vpack.c.bf16 %v1042_v48, %v1042_v48  ;;  %v1631_v48 = vld [vmem:[%s2256_s4 + $0x78] sm:$0xff] }
 0xa56   :  { %1354 = vmatpush.bf16.msrb.mxu0 %v1631_v48 }
 0xa57   :  { %v1060_v51 = vunpack.c.l.b16 %v1050_v58 }
 0xa59   :  { %v1015_v2 = vpop.xlane.xlu1 %1014 }
 0xa5a   :  { %1751 = vrcp.f32 %v1015_v2  ;;  %v1622_v2 = vld [vmem:[%s2255_s3 + $0x10] sm:$0xff] }
 0xa60   :  { %v1752_v31 = vpop.eup %1751 }
 0xa61   :  { %v1043_v3 = vmul.f32 %v1752_v31, %v1736_v1  ;;  %v1620_v1 = vld [vmem:[%s2254_s2 + $0x10] sm:$0xff] }
 0xa62   :  { %1212 = vmatpush.bf16.msrb.mxu2 %v1620_v1 }
 0xa63   :  { %v1051_v50 = vpack.c.bf16 %v1043_v3, %v1043_v3  ;;  %v1630_v3 = vld [vmem:[%s2256_s4 + $0x70] sm:$0xff] }
 0xa64   :  { %1355 = vmatpush.bf16.msrb.mxu0 %v1630_v3 }
 0xa65   :  { %v1061_v52 = vunpack.c.l.b16 %v1051_v50 }
 0xa67   :  { %v1062_v53 = vpack.c.b16 %v1061_v52, %v1060_v51 }
 0xa69   :  { %1550 = vmatmul.msk.bf16.vlgmr.msra.gmra.mxu2 %vm2296_vm5, %v1062_v53  ;;  %v1629_v53 = vld [vmem:[%s2256_s4 + $0x68] sm:$0xff] }
 0xa6a   :  { %1356 = vmatpush.bf16.msrb.mxu0 %v1629_v53 }
 0xaa3   :  { %v1153_v60 = vpop.f32.mrf.mxu1 }
 0xaa7   :  { %v1103_v57 = vpop.f32.mrf.mxu3 }
 0xaab   :  { %v1155_v54 = vpop.f32.mrf.mxu1 }
 0xaac   :  { %v1674_v62 = vpack.i.bf16 %v1155_v54, %v1153_v60 }
 0xaaf   :  { %v1128_v56 = vpop.f32.mrf.mxu0  ;;  %v1105_v61 = vpop.f32.mrf.mxu3 }
 0xab0   :  { %v1669_v55 = vpack.i.bf16 %v1105_v61, %v1103_v57 }
 0xab7   :  { %v1130_v6 = vpop.f32.mrf.mxu0 }
 0xab8   :  { %v1664_v11 = vpack.i.bf16 %v1130_v6, %v1128_v56  ;;  %v1628_v6 = vld [vmem:[%s2256_s4 + $0x60] sm:$0xff] }
 0xab9   :  { %1357 = vmatpush.bf16.msrb.mxu0 %v1628_v6 }
 0xaba   :  { %1665 = vrot.lane.b32.xlu2 %v1664_v11, %s1799_s22 }
 0xac2   :  { %1670 = vrot.lane.b32.xlu2 %v1669_v55, %s1798_s21 }
 0xaca   :  { %1675 = vrot.lane.b32.xlu2 %v1674_v62, %s1800_s23 }
 0xaec   :  { %v1078_v5 = vpop.f32.mrf.mxu2 }
 0xaf4   :  { %v1080_v10 = vpop.f32.mrf.mxu2 }
 0xb14   :  { %v1666_v4 = vpop.permute.xlu2 %1665 }
 0xb15   :  { %v1668_v14 = vunpack.i.h.bf16 %v1666_v4  ;;  %v1667_v42 = vunpack.i.l.bf16 %v1666_v4  ;;  %v1265_v4 = vperm.slane %v2188_v20, 2 }
 0xb1c   :  { %v1671_v49 = vpop.permute.xlu2 %1670 }
 0xb1d   :  { %v1673_v7 = vunpack.i.h.bf16 %v1671_v49  ;;  %v1672_v9 = vunpack.i.l.bf16 %v1671_v49 }
 0xb1f   :  { %v1183_v12 = vsel %vm223_vm1, %v1080_v10, %v1673_v7  ;;  %v1182_v13 = vsel %vm223_vm1, %v1078_v5, %v1672_v9  ;;  %v1268_v9 = vperm.slane %v2188_v20, 3 }
 0xb20   :  { %v1184_v30 = vsel %vm2297_vm8, %v1182_v13, %v1667_v42  ;;  %v1185_v18 = vsel %vm2298_vm10, %v1183_v12, %v1668_v14 }
 0xb24   :  { %v1676_v15 = vpop.permute.xlu2 %1675 }
 0xb25   :  { %v1678_v16 = vunpack.i.h.bf16 %v1676_v15  ;;  %v1677_v17 = vunpack.i.l.bf16 %v1676_v15 }
 0xb27   :  { %v1186_v59 = vsel %vm2299_vm4, %v1184_v30, %v1677_v17  ;;  %v1187_v41 = vsel %vm2300_vm7, %v1185_v18, %v1678_v16  ;;  %v1627_v16 = vld [vmem:[%s2256_s4 + $0x58] sm:$0xff]  ;;  %v1626_v17 = vld [vmem:[%s2256_s4 + $0x50] sm:$0xff]  ;;  %v1625_v30 = vld [vmem:[%s2256_s4 + $0x48] sm:$0xff] }
 0xb28   :  { %v1188_v19 = vpack.c.bf16 %v1187_v41, %v1186_v59  ;;  %1358 = vmatpush.bf16.msrb.mxu0 %v1627_v16  ;;  %v1624_v18 = vld [vmem:[%s2256_s4 + $0x40] sm:$0xff]  ;;  %v1272_v41 = vperm.slane %v2085_v47, 1  ;;  %s1802_s4 = smov [#allocation2]  }
 0xb29   :  { %s1426_s1 = sshll.u32 %s1802_s4, 4  ;;  %s1427_s1 = int_to_ptr.vmem [resolvable:$true] %s1426_s1 }
 0xb2a   :  { %1562 = vmatmul.msk.bf16.vlgmr.msrb.gmra.mxu2 %vm201_vm0, %v1188_v19 }
 0xb2c   :  { %1359 = vmatpush.bf16.msrb.mxu0 %v1626_v17 }
 0xb30   :  { %1360 = vmatpush.bf16.msrb.mxu0 %v1625_v30 }
 0xb34   :  { %1361 = vmatpush.bf16.msrb.mxu0 %v1624_v18 }
 0xbad   :  { %v1214_v21 = vpop.f32.mrf.mxu2 }
 0xbae   :  { %v1215_v23 = vadd.f32 %v1214_v21, %v1189_v8 }
 0xbb0   :  { %v1219_v24 = vadd.f32 %v1215_v23, %v2075_v43 }
 0xbb2   :  { %v1221_v22 = vsel %vm201_vm0, %v1219_v24, 0.0 }
 0xbb3   :  { %1222 = vadd.xlane.f32.xlu2 %v1221_v22 }
 0xbb5   :  { %v1216_v39 = vpop.f32.mrf.mxu2 }
 0xbb6   :  { %v1217_v26 = vadd.f32 %v1216_v39, %v1189_v8  ;;  %v1305_v39 = vperm.slane %v2188_v20, 1 }
 0xbb8   :  { %v1220_v27 = vadd.f32 %v1217_v26, %v2077_v44  ;;  %v1623_v44 = vld [vmem:[%s2255_s3 + $0x18] sm:$0xff] }
 0xbb9   :  { %1294 = vmatpush.bf16.msra.mxu3 %v1623_v44 }
 0xbba   :  { %v1224_v28 = vsel %vm201_vm0, %v1220_v27, 0.0 }
 0xbbb   :  { %1225 = vadd.xlane.f32.xlu0 %v1224_v28 }
 0xbbd   :  { %1295 = vmatpush.bf16.msra.mxu3 %v1622_v2 }
 0xc26   :  { %v1223_v29 = vpop.xlane.xlu2 %1222 }
 0xc27   :  { %v1227_v63 = vmul.f32 %v1223_v29, %v2016_v46 }
 0xc29   :  { %v1229_v32 = vsub.f32 %v1219_v24, %v1227_v63 }
 0xc2b   :  { %v1231_v33 = vmul.f32 %v1229_v32, %v1229_v32 }
 0xc2d   :  { %v1233_v34 = vsel %vm201_vm0, %v1231_v33, 0.0 }
 0xc2e   :  { %v1226_v35 = vpop.xlane.xlu0 %1225  ;;  %1234 = vadd.xlane.f32.xlu1 %v1233_v34 }
 0xc2f   :  { %v1228_v43 = vmul.f32 %v1226_v35, %v2016_v46 }
 0xc31   :  { %v1230_v36 = vsub.f32 %v1220_v27, %v1228_v43 }
 0xc33   :  { %v1232_v37 = vmul.f32 %v1230_v36, %v1230_v36 }
 0xc35   :  { %v1236_v38 = vsel %vm201_vm0, %v1232_v37, 0.0 }
 0xc36   :  { %1237 = vadd.xlane.f32.xlu0 %v1236_v38 }
 0xca1   :  { %v1235_v40 = vpop.xlane.xlu1 %1234 }
 0xca2   :  { %v1239_v45 = vmul.f32 %v1235_v40, %v2016_v46 }
 0xca4   :  { %v1241_v25 = vadd.f32 1e-05, %v1239_v45 }
 0xca6   :  { %1753 = vrsqrt.f32 %v1241_v25  ;;  %vm1249_vm9 = vweird.f32 %v1241_v25 }
 0xca9   :  { %v1238_v31 = vpop.xlane.xlu0 %1237 }
 0xcaa   :  { %v1240_v58 = vmul.f32 %v1238_v31, %v2016_v46 }
 0xcac   :  { %v1754_v50 = vpop.eup %1753  ;;  %v1242_v51 = vadd.f32 1e-05, %v1240_v58 }
 0xcad   :  { %v1244_v52 = vmul.f32 %v1754_v50, %v1241_v25  ;;  %vm1250_vm1 = vweird.f32 %v1754_v50 }
 0xcae   :  { %1755 = vrsqrt.f32 %v1242_v51  ;;  %vm1251_vm14 = vmor %vm1249_vm9, %vm1250_vm1  ;;  %vm1259_vm12 = vweird.f32 %v1242_v51 }
 0xcaf   :  { %v1245_v56 = vmul.f32 %v1754_v50, %v1244_v52 }
 0xcb1   :  { %v1246_v57 = vmul.f32 0.5, %v1245_v56 }
 0xcb3   :  { %v1247_v11 = vsub.f32 1.5, %v1246_v57 }
 0xcb4   :  { %v1756_v60 = vpop.eup %1755 }
 0xcb5   :  { %v1248_v61 = vmul.f32 %v1754_v50, %v1247_v11  ;;  %v1254_v55 = vmul.f32 %v1756_v60, %v1242_v51  ;;  %vm1260_vm15 = vweird.f32 %v1756_v60 }
 0xcb6   :  { %vm1261_vm3 = vmor %vm1259_vm12, %vm1260_vm15 }
 0xcb7   :  { %v1255_v54 = vmul.f32 %v1756_v60, %v1254_v55  ;;  %v1252_v62 = vsel %vm1251_vm14, %v1754_v50, %v1248_v61  ;;  %v1414_v61 = vperm.slane %v2188_v20, 4 }
 0xcb8   :  { %v1263_v5 = vmul.f32 %v1252_v62, %v1229_v32 }
 0xcb9   :  { %v1256_v0 = vmul.f32 0.5, %v1255_v54 }
 0xcba   :  { %v1266_v10 = vmul.f32 %v1265_v4, %v1263_v5 }
 0xcbb   :  { %v1257_v1 = vsub.f32 1.5, %v1256_v0 }
 0xcbc   :  { %v1269_v14 = vadd.f32 %v1268_v9, %v1266_v10 }
 0xcbd   :  { %v1258_v49 = vmul.f32 %v1756_v60, %v1257_v1 }
 0xcbf   :  { %v1262_v7 = vsel %vm1261_vm3, %v1756_v60, %v1258_v49 }
 0xcc0   :  { %v1264_v12 = vmul.f32 %v1262_v7, %v1230_v36 }
 0xcc2   :  { %v1267_v13 = vmul.f32 %v1265_v4, %v1264_v12 }
 0xcc4   :  { %v1270_v42 = vadd.f32 %v1268_v9, %v1267_v13 }
 0xcc6   :  { %v1271_v15 = vpack.c.bf16 %v1270_v42, %v1269_v14 }
 0xcc8   :  { %1571 = vmatmul.msk.bf16.vlgmr.msra.gmra.mxu3 %vm201_vm0, %v1271_v15 }
 0xd4b   :  { %v1297_v59 = vpop.f32.mrf.mxu3 }
 0xd4c   :  { %v1298_v19 = vadd.f32 %v1297_v59, %v1272_v41 }
 0xd4e   :  { %v1302_v23 = vmax.f32 %v1298_v19, 0.0 }
 0xd53   :  { %v1299_v8 = vpop.f32.mrf.mxu3 }
 0xd54   :  { %v1300_v21 = vadd.f32 %v1299_v8, %v1272_v41 }
 0xd56   :  { %v1303_v24 = vmax.f32 %v1300_v21, 0.0 }
 0xd58   :  { %v1304_v22 = vpack.c.bf16 %v1303_v24, %v1302_v23 }
 0xd5a   :  { %1362 = vmatmul.bf16.vlgmr.msrb.gmra.mxu0 %v1304_v22 }
 0xdd7   :  { %v1363_v26 = vpop.f32.mrf.mxu0 }
 0xdd8   :  { %v1364_v27 = vadd.f32 %v1363_v26, %v1305_v39 }
 0xdda   :  { %v1368_v28 = vadd.f32 %v1364_v27, %v1269_v14 }
 0xddc   :  { %v1370_v29 = vsel %vm201_vm0, %v1368_v28, 0.0 }
 0xddd   :  { %1371 = vadd.xlane.f32.xlu1 %v1370_v29 }
 0xddf   :  { %v1365_v63 = vpop.f32.mrf.mxu0 }
 0xde0   :  { %v1366_v32 = vadd.f32 %v1365_v63, %v1305_v39 }
 0xde2   :  { %v1369_v33 = vadd.f32 %v1366_v32, %v1270_v42 }
 0xde4   :  { %v1373_v47 = vsel %vm201_vm0, %v1369_v33, 0.0 }
 0xde5   :  { %1374 = vadd.xlane.f32.xlu0 %v1373_v47 }
 0xe50   :  { %v1372_v34 = vpop.xlane.xlu1 %1371 }
 0xe51   :  { %v1376_v35 = vmul.f32 %v1372_v34, %v2016_v46 }
 0xe53   :  { %v1378_v43 = vsub.f32 %v1368_v28, %v1376_v35 }
 0xe55   :  { %v1380_v36 = vmul.f32 %v1378_v43, %v1378_v43 }
 0xe57   :  { %v1382_v37 = vsel %vm201_vm0, %v1380_v36, 0.0 }
 0xe58   :  { %v1375_v38 = vpop.xlane.xlu0 %1374  ;;  %1383 = vadd.xlane.f32.xlu1 %v1382_v37 }
 0xe59   :  { %v1377_v44 = vmul.f32 %v1375_v38, %v2016_v46 }
 0xe5b   :  { %v1379_v40 = vsub.f32 %v1369_v33, %v1377_v44 }
 0xe5d   :  { %v1381_v45 = vmul.f32 %v1379_v40, %v1379_v40 }
 0xe5f   :  { %v1385_v2 = vsel %vm201_vm0, %v1381_v45, 0.0 }
 0xe60   :  { %1386 = vadd.xlane.f32.xlu0 %v1385_v2 }
 0xecb   :  { %v1384_v25 = vpop.xlane.xlu1 %1383 }
 0xecc   :  { %v1388_v48 = vmul.f32 %v1384_v25, %v2016_v46 }
 0xece   :  { %v1390_v31 = vadd.f32 1e-05, %v1388_v48 }
 0xed0   :  { %1757 = vrsqrt.f32 %v1390_v31  ;;  %vm1398_vm6 = vweird.f32 %v1390_v31 }
 0xed3   :  { %v1387_v58 = vpop.xlane.xlu0 %1386 }
 0xed4   :  { %v1389_v3 = vmul.f32 %v1387_v58, %v2016_v46  ;;  %v1417_v46 = vperm.slane %v2188_v20, 5 }
 0xed6   :  { %v1758_v50 = vpop.eup %1757  ;;  %v1391_v51 = vadd.f32 1e-05, %v1389_v3 }
 0xed7   :  { %v1393_v52 = vmul.f32 %v1758_v50, %v1390_v31  ;;  %vm1399_vm11 = vweird.f32 %v1758_v50 }
 0xed8   :  { %1759 = vrsqrt.f32 %v1391_v51  ;;  %vm1400_vm13 = vmor %vm1398_vm6, %vm1399_vm11  ;;  %vm1408_vm5 = vweird.f32 %v1391_v51 }
 0xed9   :  { %v1394_v53 = vmul.f32 %v1758_v50, %v1393_v52 }
 0xedb   :  { %v1395_v56 = vmul.f32 0.5, %v1394_v53 }
 0xedd   :  { %v1396_v57 = vsub.f32 1.5, %v1395_v56 }
 0xede   :  { %v1760_v6 = vpop.eup %1759 }
 0xedf   :  { %v1397_v11 = vmul.f32 %v1758_v50, %v1396_v57  ;;  %v1403_v60 = vmul.f32 %v1760_v6, %v1391_v51  ;;  %vm1409_vm2 = vweird.f32 %v1760_v6 }
 0xee0   :  { %vm1410_vm8 = vmor %vm1408_vm5, %vm1409_vm2 }
 0xee1   :  { %v1401_v55 = vsel %vm1400_vm13, %v1758_v50, %v1397_v11  ;;  %v1404_v54 = vmul.f32 %v1760_v6, %v1403_v60 }
 0xee2   :  { %v1412_v62 = vmul.f32 %v1401_v55, %v1378_v43 }
 0xee3   :  { %v1405_v0 = vmul.f32 0.5, %v1404_v54 }
 0xee4   :  { %v1415_v1 = vmul.f32 %v1414_v61, %v1412_v62 }
 0xee5   :  { %v1406_v4 = vsub.f32 1.5, %v1405_v0 }
 0xee6   :  { %v1418_v5 = vadd.f32 %v1417_v46, %v1415_v1 }
 0xee7   :  { %v1407_v49 = vmul.f32 %v1760_v6, %v1406_v4 }
 0xee8   :  { %1420 = vst.msk [vmem:[#allocation2] sm:$0xff] %vm201_vm0, %v1418_v5 }
 0xee9   :  { %v1411_v7 = vsel %vm1410_vm8, %v1760_v6, %v1407_v49 }
 0xeea   :  { %v1413_v9 = vmul.f32 %v1411_v7, %v1379_v40 }
 0xeec   :  { %v1416_v10 = vmul.f32 %v1414_v61, %v1413_v9 }
 0xeee   :  { %v1419_v20 = vadd.f32 %v1417_v46, %v1416_v10 }
 0xef0   :  { %1421 = vst.msk [vmem:[#allocation2 + $0x8] sm:$0xff] %vm201_vm0, %v1419_v20 }
 0xef1   :  { %1434 = dma.vmem_to_hbm [thread:$0]  %s1427_s1, 256, %s1429_s0, [#allocation3], %s1803_s11, %s1803_s11, %s1798_s21  }
 0xef2   :  { %1785 = dma.done.wait [#allocation3], 256  }
 0xef3   :  { %1786 = vsyncadd [#allocation3], 4294967040 }
 0xef4   :  { %1439 = vsyncpa [#allocation3], 1 }

</bundles_post_ra>
